<compile_context>
chip_gen: v7x
topology: tpu7x:2x2x1
jax: 0.10.0
libtpu: 0.0.40
codegen_flags: <defaults>
</compile_context>

<pallas_src>
import jax
import jax.numpy as jnp
from jax.experimental import pallas as pl
from jax.experimental.pallas import tpu as pltpu


def rad_recurrent_kernel(x_ref, w_ih0_ref, w_hh0_ref, b0_ref,
                         w1_ref, b1_ref, w_fc_ref, b_fc_ref,
                         gsc_ref, gsh_ref,
                         y_ref, h_out_ref, c_out_ref):
    """Whole sequence in one grid step; recurrence is an unrolled in-kernel loop."""
    H = w_hh0_ref.shape[0]
    _, Bp, _ = h_out_ref.shape          # batch already padded to the sublane tile
    T = x_ref.shape[0] // Bp

    # Hoist weights / broadcasts out of the time loop (no CSE of broadcast_in_dim).
    w_hh0 = w_hh0_ref[...]              # (H, 4H), i/f/o columns pre-scaled by 0.5
    w1 = w1_ref[...]                    # (2H, 4H) = [W_ih1; W_hh1], pre-scaled
    b1_b = jnp.broadcast_to(b1_ref[...], (Bp, 4 * H))
    g_scale = jnp.broadcast_to(gsc_ref[...], (Bp, 4 * H))   # 0.5 for i/f/o, 1.0 for g
    g_shift = jnp.broadcast_to(gsh_ref[...], (Bp, 4 * H))   # 0.5 for i/f/o, 0.0 for g

    # Layer-0 input projection for the whole sequence in one MXU pass.
    xw0_all = (jnp.dot(x_ref[...], w_ih0_ref[...],
                       preferred_element_type=jnp.float32)
               + b0_ref[...])                                # (T*Bp, 4H)

    def apply_gates(pre, c_prev):
        # ONE full-width tanh (weights pre-scaled) + one per-lane affine:
        #   i,f,o = sigmoid(z) = 0.5*tanh(0.5 z) + 0.5 ;  g = tanh(z).
        act = jnp.tanh(pre) * g_scale + g_shift
        i = act[:, 0 * H:1 * H]
        f = act[:, 1 * H:2 * H]
        g = act[:, 2 * H:3 * H]
        o = act[:, 3 * H:4 * H]
        c_new = f * c_prev + i * g
        h_new = o * jnp.tanh(c_new)
        return h_new, c_new

    # self.init(batch_size): zero hidden/cell state.
    z = jnp.zeros((Bp, H), jnp.float32)
    h0, c0, h1, c1 = z, z, z, z

    h1_steps = []
    # Fully-unrolled static time loop; all slice offsets are static & tile-aligned.
    for t in range(T):
        # layer 0: x contribution precomputed; one in-loop dot on the critical path.
        g0 = xw0_all[t * Bp:(t + 1) * Bp, :] + jnp.dot(
            h0, w_hh0, preferred_element_type=jnp.float32)
        h0, c0 = apply_gates(g0, c0)

        # layer 1 (inter-layer dropout == identity in eval mode): single fused dot
        # over the stacked [W_ih1; W_hh1] weight (K = 2H, one MXU pass).
        g1 = jnp.dot(jnp.concatenate([h0, h1], axis=-1), w1,
                     preferred_element_type=jnp.float32) + b1_b
        h1, c1 = apply_gates(g1, c1)

        # Keep h1 in vregs for the batched fc head (no VMEM scratch round-trip).
        h1_steps.append(h1)

    # dropout1 (identity) -> relu -> fc1, batched over all timesteps.
    h_all = jnp.concatenate(h1_steps, axis=0)                # (T*Bp, H)
    y_ref[...] = (jnp.dot(jnp.maximum(h_all, 0.0), w_fc_ref[...],
                          preferred_element_type=jnp.float32)
                  + b_fc_ref[...])

    # Expose final (h, c) like self.hidden.
    h_out_ref[0] = h0
    h_out_ref[1] = h1
    c_out_ref[0] = c0
    c_out_ref[1] = c1


def rad_recurrent_forward(x_btd, params):
    """x_btd: (B, T, data_dim). Returns (y: (B, T, data_dim), (h_n, c_n))."""
    (w_ih0_t, w_hh0_t, b0, w1_stacked, b1, w_fc_t, b_fc, g_scale, g_shift) = params
    B, T, D = x_btd.shape
    H = w_hh0_t.shape[0]
    L = 2
    Dout = w_fc_t.shape[1]

    # Pad batch to the 8-row sublane tile so every in-kernel slice/store is
    # whole-tile (no masked vst / sublane selects), then time-major flatten.
    SUB = 8
    Bp = ((B + SUB - 1) // SUB) * SUB
    x_pad = jnp.pad(x_btd, ((0, Bp - B), (0, 0), (0, 0)))
    x2d = jnp.transpose(x_pad, (1, 0, 2)).reshape(T * Bp, D)

    full = lambda shape: pl.BlockSpec(shape, lambda i: (0,) * len(shape))
    n_inputs = 10

    y2d, h_n, c_n = pl.pallas_call(
        rad_recurrent_kernel,
        out_shape=(
            jax.ShapeDtypeStruct((T * Bp, Dout), jnp.float32),
            jax.ShapeDtypeStruct((L, Bp, H), jnp.float32),
            jax.ShapeDtypeStruct((L, Bp, H), jnp.float32),
        ),
        grid_spec=pltpu.PrefetchScalarGridSpec(
            num_scalar_prefetch=0,
            grid=(1,),                               # whole sequence in one grid step
            in_specs=[
                full((T * Bp, D)),                   # x, flattened time-major (padded B)
                full((D, 4 * H)),                    # W_ih layer0 (transposed, pre-scaled)
                full((H, 4 * H)),                    # W_hh layer0 (transposed, pre-scaled)
                full((1, 4 * H)),                    # b_ih0 + b_hh0 (pre-scaled)
                full((2 * H, 4 * H)),                # [W_ih1; W_hh1] stacked (pre-scaled)
                full((1, 4 * H)),                    # b_ih1 + b_hh1 (pre-scaled)
                full((H, Dout)),                     # fc1 weight (transposed)
                full((1, Dout)),                     # fc1 bias
                full((1, 4 * H)),                    # gate affine scale
                full((1, 4 * H)),                    # gate affine shift
            ],
            out_specs=[
                full((T * Bp, Dout)),                # y, flattened time-major
                full((L, Bp, H)),                    # final h
                full((L, Bp, H)),                    # final c
            ],
        ),
        compiler_params=pltpu.CompilerParams(
            dimension_semantics=("arbitrary",),      # sequential recurrence inside
            allow_input_fusion=[True] * n_inputs,    # let XLA fuse pad/transpose in
        ),
    )(x2d, w_ih0_t, w_hh0_t, b0, w1_stacked, b1, w_fc_t, b_fc, g_scale, g_shift)

    y_btd = jnp.transpose(y2d.reshape(T, Bp, Dout), (1, 0, 2))[:B]
    return y_btd, (h_n[:, :B, :], c_n[:, :B, :])


def init_params(key, data_dim, lstm_dim):
    """Parameter init matching PyTorch shapes (uniform(-k, k), k=1/sqrt(H)).

    Returns (kernel_params, raw): kernel_params has i/f/o gate columns pre-scaled
    by 0.5 and layer-1 weights stacked; raw keeps unscaled PyTorch-layout weights
    for the pure-JAX reference.
    """
    H, D = lstm_dim, data_dim
    k = 1.0 / jnp.sqrt(jnp.float32(H))
    ks = jax.random.split(key, 10)
    u = lambda kk, shape: jax.random.uniform(kk, shape, jnp.float32, -k, k)

    w_ih0 = u(ks[0], (4 * H, D))      # layer 0 input-hidden
    w_hh0 = u(ks[1], (4 * H, H))
    b_ih0 = u(ks[2], (4 * H,))
    b_hh0 = u(ks[3], (4 * H,))
    w_ih1 = u(ks[4], (4 * H, H))      # layer 1 input-hidden
    w_hh1 = u(ks[5], (4 * H, H))
    b_ih1 = u(ks[6], (4 * H,))
    b_hh1 = u(ks[7], (4 * H,))
    w_fc = u(ks[8], (D, H))           # fc1: Linear(lstm_dim, data_dim)
    b_fc = u(ks[9], (D,))

    # Column pre-scaling (i, f, o by 0.5; g by 1.0) for the fused-tanh gate trick,
    # applied to the KERNEL copy only (raw reference weights stay unscaled).
    half = jnp.full((H,), 0.5, jnp.float32)
    one = jnp.ones((H,), jnp.float32)
    zero = jnp.zeros((H,), jnp.float32)
    col_scale = jnp.concatenate([half, half, one, half])          # (4H,)
    g_scale = col_scale[None, :]                                  # tanh -> sigmoid affine
    g_shift = jnp.concatenate([half, half, zero, half])[None, :]

    w_ih0_t = w_ih0.T * col_scale                                 # (D, 4H)
    w_hh0_t = w_hh0.T * col_scale                                 # (H, 4H)
    b0 = ((b_ih0 + b_hh0) * col_scale)[None, :]                   # (1, 4H)
    w1_stacked = jnp.concatenate([w_ih1.T, w_hh1.T], axis=0) * col_scale  # (2H, 4H)
    b1 = ((b_ih1 + b_hh1) * col_scale)[None, :]                   # (1, 4H)

    kernel_params = (w_ih0_t, w_hh0_t, b0, w1_stacked, b1,
                     w_fc.T, b_fc[None, :], g_scale, g_shift)
    raw = dict(w_ih0=w_ih0, w_hh0=w_hh0, b_ih0=b_ih0, b_hh0=b_hh0,
               w_ih1=w_ih1, w_hh1=w_hh1, b_ih1=b_ih1, b_hh1=b_hh1,
               w_fc=w_fc, b_fc=b_fc)
    return kernel_params, raw


def reference_forward(x_btd, raw):
    """Pure-JAX reference (lax.scan) of the same eval-mode forward (unscaled weights)."""
    B = x_btd.shape[0]
    H = raw["w_hh0"].shape[1]

    def cell(x_t, h, c, w_ih, w_hh, b_ih, b_hh):
        g = x_t @ w_ih.T + h @ w_hh.T + b_ih + b_hh
        i, f, gg, o = jnp.split(g, 4, axis=-1)
        c_new = jax.nn.sigmoid(f) * c + jax.nn.sigmoid(i) * jnp.tanh(gg)
        h_new = jax.nn.sigmoid(o) * jnp.tanh(c_new)
        return h_new, c_new

    def step(carry, x_t):
        (h0, c0, h1, c1) = carry
        h0, c0 = cell(x_t, h0, c0, raw["w_ih0"], raw["w_hh0"], raw["b_ih0"], raw["b_hh0"])
        h1, c1 = cell(h0, h1, c1, raw["w_ih1"], raw["w_hh1"], raw["b_ih1"], raw["b_hh1"])
        y = jnp.maximum(h1, 0.0) @ raw["w_fc"].T + raw["b_fc"]
        return (h0, c0, h1, c1), y

    z = jnp.zeros((B, H), jnp.float32)
    _, ys = jax.lax.scan(step, (z, z, z, z), jnp.transpose(x_btd, (1, 0, 2)))
    return jnp.transpose(ys, (1, 0, 2))


if __name__ == "__main__":
    DATA_DIM = 2
    LSTM_DIM = 32
    BATCH = 2
    SEQ = 8

    key = jax.random.PRNGKey(0)
    k_x, k_p = jax.random.split(key)
    x = jax.random.normal(k_x, (BATCH, SEQ, DATA_DIM), jnp.float32)
    kernel_params, raw = init_params(k_p, DATA_DIM, LSTM_DIM)

    fwd = jax.jit(rad_recurrent_forward)
    y, (h_n, c_n) = fwd(x, kernel_params)
    jax.block_until_ready(y)

    y_ref = reference_forward(x, raw)
    assert y.shape == (BATCH, SEQ, DATA_DIM)
    assert h_n.shape == (2, BATCH, LSTM_DIM) and c_n.shape == (2, BATCH, LSTM_DIM)
    assert jnp.allclose(y, y_ref, atol=1e-5, rtol=1e-5), "mismatch vs pure-JAX reference"

    print("KERNEL_OK")
</pallas_src>

<mosaic_0001>
module attributes {stable_mosaic.version = 11 : i64} {
  func.func @rad_recurrent_kernel(%arg0: i32, %arg1: memref<64x2xf32, #tpu.memory_space<vmem>>, %arg2: memref<2x128xf32, #tpu.memory_space<vmem>>, %arg3: memref<32x128xf32, #tpu.memory_space<vmem>>, %arg4: memref<1x128xf32, #tpu.memory_space<vmem>>, %arg5: memref<64x128xf32, #tpu.memory_space<vmem>>, %arg6: memref<1x128xf32, #tpu.memory_space<vmem>>, %arg7: memref<32x2xf32, #tpu.memory_space<vmem>>, %arg8: memref<1x2xf32, #tpu.memory_space<vmem>>, %arg9: memref<1x128xf32, #tpu.memory_space<vmem>>, %arg10: memref<1x128xf32, #tpu.memory_space<vmem>>, %arg11: memref<64x2xf32, #tpu.memory_space<vmem>>, %arg12: memref<2x8x32xf32, #tpu.memory_space<vmem>>, %arg13: memref<2x8x32xf32, #tpu.memory_space<vmem>>) attributes {dimension_semantics = [#tpu.dimension_semantics<arbitrary>], iteration_bounds = array<i64: 1>, scalar_prefetch = 0 : i64, scratch_operands = 0 : i64, tpu.core_type = #tpu.core_type<tc>, window_params = [{pipeline_mode = #tpu.pipeline_mode<synchronous>, transform_indices = @transform_0, window_bounds = array<i64: 64, 2>}, {pipeline_mode = #tpu.pipeline_mode<synchronous>, transform_indices = @transform_1, window_bounds = array<i64: 2, 128>}, {pipeline_mode = #tpu.pipeline_mode<synchronous>, transform_indices = @transform_2, window_bounds = array<i64: 32, 128>}, {pipeline_mode = #tpu.pipeline_mode<synchronous>, transform_indices = @transform_3, window_bounds = array<i64: 1, 128>}, {pipeline_mode = #tpu.pipeline_mode<synchronous>, transform_indices = @transform_4, window_bounds = array<i64: 64, 128>}, {pipeline_mode = #tpu.pipeline_mode<synchronous>, transform_indices = @transform_5, window_bounds = array<i64: 1, 128>}, {pipeline_mode = #tpu.pipeline_mode<synchronous>, transform_indices = @transform_6, window_bounds = array<i64: 32, 2>}, {pipeline_mode = #tpu.pipeline_mode<synchronous>, transform_indices = @transform_7, window_bounds = array<i64: 1, 2>}, {pipeline_mode = #tpu.pipeline_mode<synchronous>, transform_indices = @transform_8, window_bounds = array<i64: 1, 128>}, {pipeline_mode = #tpu.pipeline_mode<synchronous>, transform_indices = @transform_9, window_bounds = array<i64: 1, 128>}, {pipeline_mode = #tpu.pipeline_mode<synchronous>, transform_indices = @transform_10, window_bounds = array<i64: 64, 2>}, {pipeline_mode = #tpu.pipeline_mode<synchronous>, transform_indices = @transform_11, window_bounds = array<i64: 2, 8, 32>}, {pipeline_mode = #tpu.pipeline_mode<synchronous>, transform_indices = @transform_12, window_bounds = array<i64: 2, 8, 32>}]} {
    %c0 = arith.constant 0 : index
    %c0_0 = arith.constant 0 : index
    %0 = vector.load %arg3[%c0, %c0_0] : memref<32x128xf32, #tpu.memory_space<vmem>>, vector<32x128xf32>
    %c0_1 = arith.constant 0 : index
    %c0_2 = arith.constant 0 : index
    %1 = vector.load %arg5[%c0_1, %c0_2] : memref<64x128xf32, #tpu.memory_space<vmem>>, vector<64x128xf32>
    %c0_3 = arith.constant 0 : index
    %c0_4 = arith.constant 0 : index
    %2 = vector.load %arg6[%c0_3, %c0_4] : memref<1x128xf32, #tpu.memory_space<vmem>>, vector<1x128xf32>
    %3 = vector.shape_cast %2 : vector<1x128xf32> to vector<1x128xf32>
    %4 = vector.broadcast %3 : vector<1x128xf32> to vector<8x128xf32>
    %c0_5 = arith.constant 0 : index
    %c0_6 = arith.constant 0 : index
    %5 = vector.load %arg9[%c0_5, %c0_6] : memref<1x128xf32, #tpu.memory_space<vmem>>, vector<1x128xf32>
    %6 = vector.shape_cast %5 : vector<1x128xf32> to vector<1x128xf32>
    %7 = vector.broadcast %6 : vector<1x128xf32> to vector<8x128xf32>
    %c0_7 = arith.constant 0 : index
    %c0_8 = arith.constant 0 : index
    %8 = vector.load %arg10[%c0_7, %c0_8] : memref<1x128xf32, #tpu.memory_space<vmem>>, vector<1x128xf32>
    %9 = vector.shape_cast %8 : vector<1x128xf32> to vector<1x128xf32>
    %10 = vector.broadcast %9 : vector<1x128xf32> to vector<8x128xf32>
    %c0_9 = arith.constant 0 : index
    %c0_10 = arith.constant 0 : index
    %11 = vector.load %arg1[%c0_9, %c0_10] : memref<64x2xf32, #tpu.memory_space<vmem>>, vector<64x2xf32>
    %c0_11 = arith.constant 0 : index
    %c0_12 = arith.constant 0 : index
    %12 = vector.load %arg2[%c0_11, %c0_12] : memref<2x128xf32, #tpu.memory_space<vmem>>, vector<2x128xf32>
    %cst = arith.constant dense<0.000000e+00> : vector<64x128xf32>
    %13 = tpu.matmul %11, %12, %cst {dimension_numbers = #tpu.dot_dimension_numbers<[1], [0], [0], [1], [0, 0, 1, 1], [], []>} : vector<64x2xf32>, vector<2x128xf32>, vector<64x128xf32> -> vector<64x128xf32>
    %c0_13 = arith.constant 0 : index
    %c0_14 = arith.constant 0 : index
    %14 = vector.load %arg4[%c0_13, %c0_14] : memref<1x128xf32, #tpu.memory_space<vmem>>, vector<1x128xf32>
    %15 = vector.broadcast %14 : vector<1x128xf32> to vector<64x128xf32>
    %16 = arith.addf %13, %15 : vector<64x128xf32>
    %cst_15 = arith.constant 0.000000e+00 : f32
    %17 = vector.broadcast %cst_15 : f32 to vector<8x32xf32>
    %18 = vector.extract_strided_slice %16 {offsets = [0, 0], sizes = [8, 128], strides = [1, 1]} : vector<64x128xf32> to vector<8x128xf32>
    %cst_16 = arith.constant dense<0.000000e+00> : vector<8x128xf32>
    %19 = tpu.matmul %17, %0, %cst_16 {dimension_numbers = #tpu.dot_dimension_numbers<[1], [0], [0], [1], [0, 0, 1, 1], [], []>} : vector<8x32xf32>, vector<32x128xf32>, vector<8x128xf32> -> vector<8x128xf32>
    %20 = arith.addf %18, %19 : vector<8x128xf32>
    %21 = math.tanh %20 : vector<8x128xf32>
    %22 = arith.mulf %21, %7 : vector<8x128xf32>
    %23 = arith.addf %22, %10 : vector<8x128xf32>
    %24 = vector.extract_strided_slice %23 {offsets = [0, 0], sizes = [8, 32], strides = [1, 1]} : vector<8x128xf32> to vector<8x32xf32>
    %25 = vector.extract_strided_slice %23 {offsets = [0, 32], sizes = [8, 32], strides = [1, 1]} : vector<8x128xf32> to vector<8x32xf32>
    %26 = vector.extract_strided_slice %23 {offsets = [0, 64], sizes = [8, 32], strides = [1, 1]} : vector<8x128xf32> to vector<8x32xf32>
    %27 = vector.extract_strided_slice %23 {offsets = [0, 96], sizes = [8, 32], strides = [1, 1]} : vector<8x128xf32> to vector<8x32xf32>
    %28 = arith.mulf %25, %17 : vector<8x32xf32>
    %29 = arith.mulf %24, %26 : vector<8x32xf32>
    %30 = arith.addf %28, %29 : vector<8x32xf32>
    %31 = math.tanh %30 : vector<8x32xf32>
    %32 = arith.mulf %27, %31 : vector<8x32xf32>
    %33 = tpu.concatenate %32, %17 in 1 : vector<8x32xf32>, vector<8x32xf32> -> vector<8x64xf32>
    %cst_17 = arith.constant dense<0.000000e+00> : vector<8x128xf32>
    %34 = tpu.matmul %33, %1, %cst_17 {dimension_numbers = #tpu.dot_dimension_numbers<[1], [0], [0], [1], [0, 0, 1, 1], [], []>} : vector<8x64xf32>, vector<64x128xf32>, vector<8x128xf32> -> vector<8x128xf32>
    %35 = arith.addf %34, %4 : vector<8x128xf32>
    %36 = math.tanh %35 : vector<8x128xf32>
    %37 = arith.mulf %36, %7 : vector<8x128xf32>
    %38 = arith.addf %37, %10 : vector<8x128xf32>
    %39 = vector.extract_strided_slice %38 {offsets = [0, 0], sizes = [8, 32], strides = [1, 1]} : vector<8x128xf32> to vector<8x32xf32>
    %40 = vector.extract_strided_slice %38 {offsets = [0, 32], sizes = [8, 32], strides = [1, 1]} : vector<8x128xf32> to vector<8x32xf32>
    %41 = vector.extract_strided_slice %38 {offsets = [0, 64], sizes = [8, 32], strides = [1, 1]} : vector<8x128xf32> to vector<8x32xf32>
    %42 = vector.extract_strided_slice %38 {offsets = [0, 96], sizes = [8, 32], strides = [1, 1]} : vector<8x128xf32> to vector<8x32xf32>
    %43 = arith.mulf %40, %17 : vector<8x32xf32>
    %44 = arith.mulf %39, %41 : vector<8x32xf32>
    %45 = arith.addf %43, %44 : vector<8x32xf32>
    %46 = math.tanh %45 : vector<8x32xf32>
    %47 = arith.mulf %42, %46 : vector<8x32xf32>
    %48 = vector.extract_strided_slice %16 {offsets = [8, 0], sizes = [8, 128], strides = [1, 1]} : vector<64x128xf32> to vector<8x128xf32>
    %cst_18 = arith.constant dense<0.000000e+00> : vector<8x128xf32>
    %49 = tpu.matmul %32, %0, %cst_18 {dimension_numbers = #tpu.dot_dimension_numbers<[1], [0], [0], [1], [0, 0, 1, 1], [], []>} : vector<8x32xf32>, vector<32x128xf32>, vector<8x128xf32> -> vector<8x128xf32>
    %50 = arith.addf %48, %49 : vector<8x128xf32>
    %51 = math.tanh %50 : vector<8x128xf32>
    %52 = arith.mulf %51, %7 : vector<8x128xf32>
    %53 = arith.addf %52, %10 : vector<8x128xf32>
    %54 = vector.extract_strided_slice %53 {offsets = [0, 0], sizes = [8, 32], strides = [1, 1]} : vector<8x128xf32> to vector<8x32xf32>
    %55 = vector.extract_strided_slice %53 {offsets = [0, 32], sizes = [8, 32], strides = [1, 1]} : vector<8x128xf32> to vector<8x32xf32>
    %56 = vector.extract_strided_slice %53 {offsets = [0, 64], sizes = [8, 32], strides = [1, 1]} : vector<8x128xf32> to vector<8x32xf32>
    %57 = vector.extract_strided_slice %53 {offsets = [0, 96], sizes = [8, 32], strides = [1, 1]} : vector<8x128xf32> to vector<8x32xf32>
    %58 = arith.mulf %55, %30 : vector<8x32xf32>
    %59 = arith.mulf %54, %56 : vector<8x32xf32>
    %60 = arith.addf %58, %59 : vector<8x32xf32>
    %61 = math.tanh %60 : vector<8x32xf32>
    %62 = arith.mulf %57, %61 : vector<8x32xf32>
    %63 = tpu.concatenate %62, %47 in 1 : vector<8x32xf32>, vector<8x32xf32> -> vector<8x64xf32>
    %cst_19 = arith.constant dense<0.000000e+00> : vector<8x128xf32>
    %64 = tpu.matmul %63, %1, %cst_19 {dimension_numbers = #tpu.dot_dimension_numbers<[1], [0], [0], [1], [0, 0, 1, 1], [], []>} : vector<8x64xf32>, vector<64x128xf32>, vector<8x128xf32> -> vector<8x128xf32>
    %65 = arith.addf %64, %4 : vector<8x128xf32>
    %66 = math.tanh %65 : vector<8x128xf32>
    %67 = arith.mulf %66, %7 : vector<8x128xf32>
    %68 = arith.addf %67, %10 : vector<8x128xf32>
    %69 = vector.extract_strided_slice %68 {offsets = [0, 0], sizes = [8, 32], strides = [1, 1]} : vector<8x128xf32> to vector<8x32xf32>
    %70 = vector.extract_strided_slice %68 {offsets = [0, 32], sizes = [8, 32], strides = [1, 1]} : vector<8x128xf32> to vector<8x32xf32>
    %71 = vector.extract_strided_slice %68 {offsets = [0, 64], sizes = [8, 32], strides = [1, 1]} : vector<8x128xf32> to vector<8x32xf32>
    %72 = vector.extract_strided_slice %68 {offsets = [0, 96], sizes = [8, 32], strides = [1, 1]} : vector<8x128xf32> to vector<8x32xf32>
    %73 = arith.mulf %70, %45 : vector<8x32xf32>
    %74 = arith.mulf %69, %71 : vector<8x32xf32>
    %75 = arith.addf %73, %74 : vector<8x32xf32>
    %76 = math.tanh %75 : vector<8x32xf32>
    %77 = arith.mulf %72, %76 : vector<8x32xf32>
    %78 = vector.extract_strided_slice %16 {offsets = [16, 0], sizes = [8, 128], strides = [1, 1]} : vector<64x128xf32> to vector<8x128xf32>
    %cst_20 = arith.constant dense<0.000000e+00> : vector<8x128xf32>
    %79 = tpu.matmul %62, %0, %cst_20 {dimension_numbers = #tpu.dot_dimension_numbers<[1], [0], [0], [1], [0, 0, 1, 1], [], []>} : vector<8x32xf32>, vector<32x128xf32>, vector<8x128xf32> -> vector<8x128xf32>
    %80 = arith.addf %78, %79 : vector<8x128xf32>
    %81 = math.tanh %80 : vector<8x128xf32>
    %82 = arith.mulf %81, %7 : vector<8x128xf32>
    %83 = arith.addf %82, %10 : vector<8x128xf32>
    %84 = vector.extract_strided_slice %83 {offsets = [0, 0], sizes = [8, 32], strides = [1, 1]} : vector<8x128xf32> to vector<8x32xf32>
    %85 = vector.extract_strided_slice %83 {offsets = [0, 32], sizes = [8, 32], strides = [1, 1]} : vector<8x128xf32> to vector<8x32xf32>
    %86 = vector.extract_strided_slice %83 {offsets = [0, 64], sizes = [8, 32], strides = [1, 1]} : vector<8x128xf32> to vector<8x32xf32>
    %87 = vector.extract_strided_slice %83 {offsets = [0, 96], sizes = [8, 32], strides = [1, 1]} : vector<8x128xf32> to vector<8x32xf32>
    %88 = arith.mulf %85, %60 : vector<8x32xf32>
    %89 = arith.mulf %84, %86 : vector<8x32xf32>
    %90 = arith.addf %88, %89 : vector<8x32xf32>
    %91 = math.tanh %90 : vector<8x32xf32>
    %92 = arith.mulf %87, %91 : vector<8x32xf32>
    %93 = tpu.concatenate %92, %77 in 1 : vector<8x32xf32>, vector<8x32xf32> -> vector<8x64xf32>
    %cst_21 = arith.constant dense<0.000000e+00> : vector<8x128xf32>
    %94 = tpu.matmul %93, %1, %cst_21 {dimension_numbers = #tpu.dot_dimension_numbers<[1], [0], [0], [1], [0, 0, 1, 1], [], []>} : vector<8x64xf32>, vector<64x128xf32>, vector<8x128xf32> -> vector<8x128xf32>
    %95 = arith.addf %94, %4 : vector<8x128xf32>
    %96 = math.tanh %95 : vector<8x128xf32>
    %97 = arith.mulf %96, %7 : vector<8x128xf32>
    %98 = arith.addf %97, %10 : vector<8x128xf32>
    %99 = vector.extract_strided_slice %98 {offsets = [0, 0], sizes = [8, 32], strides = [1, 1]} : vector<8x128xf32> to vector<8x32xf32>
    %100 = vector.extract_strided_slice %98 {offsets = [0, 32], sizes = [8, 32], strides = [1, 1]} : vector<8x128xf32> to vector<8x32xf32>
    %101 = vector.extract_strided_slice %98 {offsets = [0, 64], sizes = [8, 32], strides = [1, 1]} : vector<8x128xf32> to vector<8x32xf32>
    %102 = vector.extract_strided_slice %98 {offsets = [0, 96], sizes = [8, 32], strides = [1, 1]} : vector<8x128xf32> to vector<8x32xf32>
    %103 = arith.mulf %100, %75 : vector<8x32xf32>
    %104 = arith.mulf %99, %101 : vector<8x32xf32>
    %105 = arith.addf %103, %104 : vector<8x32xf32>
    %106 = math.tanh %105 : vector<8x32xf32>
    %107 = arith.mulf %102, %106 : vector<8x32xf32>
    %108 = vector.extract_strided_slice %16 {offsets = [24, 0], sizes = [8, 128], strides = [1, 1]} : vector<64x128xf32> to vector<8x128xf32>
    %cst_22 = arith.constant dense<0.000000e+00> : vector<8x128xf32>
    %109 = tpu.matmul %92, %0, %cst_22 {dimension_numbers = #tpu.dot_dimension_numbers<[1], [0], [0], [1], [0, 0, 1, 1], [], []>} : vector<8x32xf32>, vector<32x128xf32>, vector<8x128xf32> -> vector<8x128xf32>
    %110 = arith.addf %108, %109 : vector<8x128xf32>
    %111 = math.tanh %110 : vector<8x128xf32>
    %112 = arith.mulf %111, %7 : vector<8x128xf32>
    %113 = arith.addf %112, %10 : vector<8x128xf32>
    %114 = vector.extract_strided_slice %113 {offsets = [0, 0], sizes = [8, 32], strides = [1, 1]} : vector<8x128xf32> to vector<8x32xf32>
    %115 = vector.extract_strided_slice %113 {offsets = [0, 32], sizes = [8, 32], strides = [1, 1]} : vector<8x128xf32> to vector<8x32xf32>
    %116 = vector.extract_strided_slice %113 {offsets = [0, 64], sizes = [8, 32], strides = [1, 1]} : vector<8x128xf32> to vector<8x32xf32>
    %117 = vector.extract_strided_slice %113 {offsets = [0, 96], sizes = [8, 32], strides = [1, 1]} : vector<8x128xf32> to vector<8x32xf32>
    %118 = arith.mulf %115, %90 : vector<8x32xf32>
    %119 = arith.mulf %114, %116 : vector<8x32xf32>
    %120 = arith.addf %118, %119 : vector<8x32xf32>
    %121 = math.tanh %120 : vector<8x32xf32>
    %122 = arith.mulf %117, %121 : vector<8x32xf32>
    %123 = tpu.concatenate %122, %107 in 1 : vector<8x32xf32>, vector<8x32xf32> -> vector<8x64xf32>
    %cst_23 = arith.constant dense<0.000000e+00> : vector<8x128xf32>
    %124 = tpu.matmul %123, %1, %cst_23 {dimension_numbers = #tpu.dot_dimension_numbers<[1], [0], [0], [1], [0, 0, 1, 1], [], []>} : vector<8x64xf32>, vector<64x128xf32>, vector<8x128xf32> -> vector<8x128xf32>
    %125 = arith.addf %124, %4 : vector<8x128xf32>
    %126 = math.tanh %125 : vector<8x128xf32>
    %127 = arith.mulf %126, %7 : vector<8x128xf32>
    %128 = arith.addf %127, %10 : vector<8x128xf32>
    %129 = vector.extract_strided_slice %128 {offsets = [0, 0], sizes = [8, 32], strides = [1, 1]} : vector<8x128xf32> to vector<8x32xf32>
    %130 = vector.extract_strided_slice %128 {offsets = [0, 32], sizes = [8, 32], strides = [1, 1]} : vector<8x128xf32> to vector<8x32xf32>
    %131 = vector.extract_strided_slice %128 {offsets = [0, 64], sizes = [8, 32], strides = [1, 1]} : vector<8x128xf32> to vector<8x32xf32>
    %132 = vector.extract_strided_slice %128 {offsets = [0, 96], sizes = [8, 32], strides = [1, 1]} : vector<8x128xf32> to vector<8x32xf32>
    %133 = arith.mulf %130, %105 : vector<8x32xf32>
    %134 = arith.mulf %129, %131 : vector<8x32xf32>
    %135 = arith.addf %133, %134 : vector<8x32xf32>
    %136 = math.tanh %135 : vector<8x32xf32>
    %137 = arith.mulf %132, %136 : vector<8x32xf32>
    %138 = vector.extract_strided_slice %16 {offsets = [32, 0], sizes = [8, 128], strides = [1, 1]} : vector<64x128xf32> to vector<8x128xf32>
    %cst_24 = arith.constant dense<0.000000e+00> : vector<8x128xf32>
    %139 = tpu.matmul %122, %0, %cst_24 {dimension_numbers = #tpu.dot_dimension_numbers<[1], [0], [0], [1], [0, 0, 1, 1], [], []>} : vector<8x32xf32>, vector<32x128xf32>, vector<8x128xf32> -> vector<8x128xf32>
    %140 = arith.addf %138, %139 : vector<8x128xf32>
    %141 = math.tanh %140 : vector<8x128xf32>
    %142 = arith.mulf %141, %7 : vector<8x128xf32>
    %143 = arith.addf %142, %10 : vector<8x128xf32>
    %144 = vector.extract_strided_slice %143 {offsets = [0, 0], sizes = [8, 32], strides = [1, 1]} : vector<8x128xf32> to vector<8x32xf32>
    %145 = vector.extract_strided_slice %143 {offsets = [0, 32], sizes = [8, 32], strides = [1, 1]} : vector<8x128xf32> to vector<8x32xf32>
    %146 = vector.extract_strided_slice %143 {offsets = [0, 64], sizes = [8, 32], strides = [1, 1]} : vector<8x128xf32> to vector<8x32xf32>
    %147 = vector.extract_strided_slice %143 {offsets = [0, 96], sizes = [8, 32], strides = [1, 1]} : vector<8x128xf32> to vector<8x32xf32>
    %148 = arith.mulf %145, %120 : vector<8x32xf32>
    %149 = arith.mulf %144, %146 : vector<8x32xf32>
    %150 = arith.addf %148, %149 : vector<8x32xf32>
    %151 = math.tanh %150 : vector<8x32xf32>
    %152 = arith.mulf %147, %151 : vector<8x32xf32>
    %153 = tpu.concatenate %152, %137 in 1 : vector<8x32xf32>, vector<8x32xf32> -> vector<8x64xf32>
    %cst_25 = arith.constant dense<0.000000e+00> : vector<8x128xf32>
    %154 = tpu.matmul %153, %1, %cst_25 {dimension_numbers = #tpu.dot_dimension_numbers<[1], [0], [0], [1], [0, 0, 1, 1], [], []>} : vector<8x64xf32>, vector<64x128xf32>, vector<8x128xf32> -> vector<8x128xf32>
    %155 = arith.addf %154, %4 : vector<8x128xf32>
    %156 = math.tanh %155 : vector<8x128xf32>
    %157 = arith.mulf %156, %7 : vector<8x128xf32>
    %158 = arith.addf %157, %10 : vector<8x128xf32>
    %159 = vector.extract_strided_slice %158 {offsets = [0, 0], sizes = [8, 32], strides = [1, 1]} : vector<8x128xf32> to vector<8x32xf32>
    %160 = vector.extract_strided_slice %158 {offsets = [0, 32], sizes = [8, 32], strides = [1, 1]} : vector<8x128xf32> to vector<8x32xf32>
    %161 = vector.extract_strided_slice %158 {offsets = [0, 64], sizes = [8, 32], strides = [1, 1]} : vector<8x128xf32> to vector<8x32xf32>
    %162 = vector.extract_strided_slice %158 {offsets = [0, 96], sizes = [8, 32], strides = [1, 1]} : vector<8x128xf32> to vector<8x32xf32>
    %163 = arith.mulf %160, %135 : vector<8x32xf32>
    %164 = arith.mulf %159, %161 : vector<8x32xf32>
    %165 = arith.addf %163, %164 : vector<8x32xf32>
    %166 = math.tanh %165 : vector<8x32xf32>
    %167 = arith.mulf %162, %166 : vector<8x32xf32>
    %168 = vector.extract_strided_slice %16 {offsets = [40, 0], sizes = [8, 128], strides = [1, 1]} : vector<64x128xf32> to vector<8x128xf32>
    %cst_26 = arith.constant dense<0.000000e+00> : vector<8x128xf32>
    %169 = tpu.matmul %152, %0, %cst_26 {dimension_numbers = #tpu.dot_dimension_numbers<[1], [0], [0], [1], [0, 0, 1, 1], [], []>} : vector<8x32xf32>, vector<32x128xf32>, vector<8x128xf32> -> vector<8x128xf32>
    %170 = arith.addf %168, %169 : vector<8x128xf32>
    %171 = math.tanh %170 : vector<8x128xf32>
    %172 = arith.mulf %171, %7 : vector<8x128xf32>
    %173 = arith.addf %172, %10 : vector<8x128xf32>
    %174 = vector.extract_strided_slice %173 {offsets = [0, 0], sizes = [8, 32], strides = [1, 1]} : vector<8x128xf32> to vector<8x32xf32>
    %175 = vector.extract_strided_slice %173 {offsets = [0, 32], sizes = [8, 32], strides = [1, 1]} : vector<8x128xf32> to vector<8x32xf32>
    %176 = vector.extract_strided_slice %173 {offsets = [0, 64], sizes = [8, 32], strides = [1, 1]} : vector<8x128xf32> to vector<8x32xf32>
    %177 = vector.extract_strided_slice %173 {offsets = [0, 96], sizes = [8, 32], strides = [1, 1]} : vector<8x128xf32> to vector<8x32xf32>
    %178 = arith.mulf %175, %150 : vector<8x32xf32>
    %179 = arith.mulf %174, %176 : vector<8x32xf32>
    %180 = arith.addf %178, %179 : vector<8x32xf32>
    %181 = math.tanh %180 : vector<8x32xf32>
    %182 = arith.mulf %177, %181 : vector<8x32xf32>
    %183 = tpu.concatenate %182, %167 in 1 : vector<8x32xf32>, vector<8x32xf32> -> vector<8x64xf32>
    %cst_27 = arith.constant dense<0.000000e+00> : vector<8x128xf32>
    %184 = tpu.matmul %183, %1, %cst_27 {dimension_numbers = #tpu.dot_dimension_numbers<[1], [0], [0], [1], [0, 0, 1, 1], [], []>} : vector<8x64xf32>, vector<64x128xf32>, vector<8x128xf32> -> vector<8x128xf32>
    %185 = arith.addf %184, %4 : vector<8x128xf32>
    %186 = math.tanh %185 : vector<8x128xf32>
    %187 = arith.mulf %186, %7 : vector<8x128xf32>
    %188 = arith.addf %187, %10 : vector<8x128xf32>
    %189 = vector.extract_strided_slice %188 {offsets = [0, 0], sizes = [8, 32], strides = [1, 1]} : vector<8x128xf32> to vector<8x32xf32>
    %190 = vector.extract_strided_slice %188 {offsets = [0, 32], sizes = [8, 32], strides = [1, 1]} : vector<8x128xf32> to vector<8x32xf32>
    %191 = vector.extract_strided_slice %188 {offsets = [0, 64], sizes = [8, 32], strides = [1, 1]} : vector<8x128xf32> to vector<8x32xf32>
    %192 = vector.extract_strided_slice %188 {offsets = [0, 96], sizes = [8, 32], strides = [1, 1]} : vector<8x128xf32> to vector<8x32xf32>
    %193 = arith.mulf %190, %165 : vector<8x32xf32>
    %194 = arith.mulf %189, %191 : vector<8x32xf32>
    %195 = arith.addf %193, %194 : vector<8x32xf32>
    %196 = math.tanh %195 : vector<8x32xf32>
    %197 = arith.mulf %192, %196 : vector<8x32xf32>
    %198 = vector.extract_strided_slice %16 {offsets = [48, 0], sizes = [8, 128], strides = [1, 1]} : vector<64x128xf32> to vector<8x128xf32>
    %cst_28 = arith.constant dense<0.000000e+00> : vector<8x128xf32>
    %199 = tpu.matmul %182, %0, %cst_28 {dimension_numbers = #tpu.dot_dimension_numbers<[1], [0], [0], [1], [0, 0, 1, 1], [], []>} : vector<8x32xf32>, vector<32x128xf32>, vector<8x128xf32> -> vector<8x128xf32>
    %200 = arith.addf %198, %199 : vector<8x128xf32>
    %201 = math.tanh %200 : vector<8x128xf32>
    %202 = arith.mulf %201, %7 : vector<8x128xf32>
    %203 = arith.addf %202, %10 : vector<8x128xf32>
    %204 = vector.extract_strided_slice %203 {offsets = [0, 0], sizes = [8, 32], strides = [1, 1]} : vector<8x128xf32> to vector<8x32xf32>
    %205 = vector.extract_strided_slice %203 {offsets = [0, 32], sizes = [8, 32], strides = [1, 1]} : vector<8x128xf32> to vector<8x32xf32>
    %206 = vector.extract_strided_slice %203 {offsets = [0, 64], sizes = [8, 32], strides = [1, 1]} : vector<8x128xf32> to vector<8x32xf32>
    %207 = vector.extract_strided_slice %203 {offsets = [0, 96], sizes = [8, 32], strides = [1, 1]} : vector<8x128xf32> to vector<8x32xf32>
    %208 = arith.mulf %205, %180 : vector<8x32xf32>
    %209 = arith.mulf %204, %206 : vector<8x32xf32>
    %210 = arith.addf %208, %209 : vector<8x32xf32>
    %211 = math.tanh %210 : vector<8x32xf32>
    %212 = arith.mulf %207, %211 : vector<8x32xf32>
    %213 = tpu.concatenate %212, %197 in 1 : vector<8x32xf32>, vector<8x32xf32> -> vector<8x64xf32>
    %cst_29 = arith.constant dense<0.000000e+00> : vector<8x128xf32>
    %214 = tpu.matmul %213, %1, %cst_29 {dimension_numbers = #tpu.dot_dimension_numbers<[1], [0], [0], [1], [0, 0, 1, 1], [], []>} : vector<8x64xf32>, vector<64x128xf32>, vector<8x128xf32> -> vector<8x128xf32>
    %215 = arith.addf %214, %4 : vector<8x128xf32>
    %216 = math.tanh %215 : vector<8x128xf32>
    %217 = arith.mulf %216, %7 : vector<8x128xf32>
    %218 = arith.addf %217, %10 : vector<8x128xf32>
    %219 = vector.extract_strided_slice %218 {offsets = [0, 0], sizes = [8, 32], strides = [1, 1]} : vector<8x128xf32> to vector<8x32xf32>
    %220 = vector.extract_strided_slice %218 {offsets = [0, 32], sizes = [8, 32], strides = [1, 1]} : vector<8x128xf32> to vector<8x32xf32>
    %221 = vector.extract_strided_slice %218 {offsets = [0, 64], sizes = [8, 32], strides = [1, 1]} : vector<8x128xf32> to vector<8x32xf32>
    %222 = vector.extract_strided_slice %218 {offsets = [0, 96], sizes = [8, 32], strides = [1, 1]} : vector<8x128xf32> to vector<8x32xf32>
    %223 = arith.mulf %220, %195 : vector<8x32xf32>
    %224 = arith.mulf %219, %221 : vector<8x32xf32>
    %225 = arith.addf %223, %224 : vector<8x32xf32>
    %226 = math.tanh %225 : vector<8x32xf32>
    %227 = arith.mulf %222, %226 : vector<8x32xf32>
    %228 = vector.extract_strided_slice %16 {offsets = [56, 0], sizes = [8, 128], strides = [1, 1]} : vector<64x128xf32> to vector<8x128xf32>
    %cst_30 = arith.constant dense<0.000000e+00> : vector<8x128xf32>
    %229 = tpu.matmul %212, %0, %cst_30 {dimension_numbers = #tpu.dot_dimension_numbers<[1], [0], [0], [1], [0, 0, 1, 1], [], []>} : vector<8x32xf32>, vector<32x128xf32>, vector<8x128xf32> -> vector<8x128xf32>
    %230 = arith.addf %228, %229 : vector<8x128xf32>
    %231 = math.tanh %230 : vector<8x128xf32>
    %232 = arith.mulf %231, %7 : vector<8x128xf32>
    %233 = arith.addf %232, %10 : vector<8x128xf32>
    %234 = vector.extract_strided_slice %233 {offsets = [0, 0], sizes = [8, 32], strides = [1, 1]} : vector<8x128xf32> to vector<8x32xf32>
    %235 = vector.extract_strided_slice %233 {offsets = [0, 32], sizes = [8, 32], strides = [1, 1]} : vector<8x128xf32> to vector<8x32xf32>
    %236 = vector.extract_strided_slice %233 {offsets = [0, 64], sizes = [8, 32], strides = [1, 1]} : vector<8x128xf32> to vector<8x32xf32>
    %237 = vector.extract_strided_slice %233 {offsets = [0, 96], sizes = [8, 32], strides = [1, 1]} : vector<8x128xf32> to vector<8x32xf32>
    %238 = arith.mulf %235, %210 : vector<8x32xf32>
    %239 = arith.mulf %234, %236 : vector<8x32xf32>
    %240 = arith.addf %238, %239 : vector<8x32xf32>
    %241 = math.tanh %240 : vector<8x32xf32>
    %242 = arith.mulf %237, %241 : vector<8x32xf32>
    %243 = tpu.concatenate %242, %227 in 1 : vector<8x32xf32>, vector<8x32xf32> -> vector<8x64xf32>
    %cst_31 = arith.constant dense<0.000000e+00> : vector<8x128xf32>
    %244 = tpu.matmul %243, %1, %cst_31 {dimension_numbers = #tpu.dot_dimension_numbers<[1], [0], [0], [1], [0, 0, 1, 1], [], []>} : vector<8x64xf32>, vector<64x128xf32>, vector<8x128xf32> -> vector<8x128xf32>
    %245 = arith.addf %244, %4 : vector<8x128xf32>
    %246 = math.tanh %245 : vector<8x128xf32>
    %247 = arith.mulf %246, %7 : vector<8x128xf32>
    %248 = arith.addf %247, %10 : vector<8x128xf32>
    %249 = vector.extract_strided_slice %248 {offsets = [0, 0], sizes = [8, 32], strides = [1, 1]} : vector<8x128xf32> to vector<8x32xf32>
    %250 = vector.extract_strided_slice %248 {offsets = [0, 32], sizes = [8, 32], strides = [1, 1]} : vector<8x128xf32> to vector<8x32xf32>
    %251 = vector.extract_strided_slice %248 {offsets = [0, 64], sizes = [8, 32], strides = [1, 1]} : vector<8x128xf32> to vector<8x32xf32>
    %252 = vector.extract_strided_slice %248 {offsets = [0, 96], sizes = [8, 32], strides = [1, 1]} : vector<8x128xf32> to vector<8x32xf32>
    %253 = arith.mulf %250, %225 : vector<8x32xf32>
    %254 = arith.mulf %249, %251 : vector<8x32xf32>
    %255 = arith.addf %253, %254 : vector<8x32xf32>
    %256 = math.tanh %255 : vector<8x32xf32>
    %257 = arith.mulf %252, %256 : vector<8x32xf32>
    %258 = tpu.concatenate %47, %77, %107, %137, %167, %197, %227, %257 in 0 : vector<8x32xf32>, vector<8x32xf32>, vector<8x32xf32>, vector<8x32xf32>, vector<8x32xf32>, vector<8x32xf32>, vector<8x32xf32>, vector<8x32xf32> -> vector<64x32xf32>
    %cst_32 = arith.constant 0.000000e+00 : f32
    %259 = vector.broadcast %cst_32 : f32 to vector<64x32xf32>
    %260 = arith.maximumf %258, %259 : vector<64x32xf32>
    %c0_33 = arith.constant 0 : index
    %c0_34 = arith.constant 0 : index
    %261 = vector.load %arg7[%c0_33, %c0_34] : memref<32x2xf32, #tpu.memory_space<vmem>>, vector<32x2xf32>
    %cst_35 = arith.constant dense<0.000000e+00> : vector<64x2xf32>
    %262 = tpu.matmul %260, %261, %cst_35 {dimension_numbers = #tpu.dot_dimension_numbers<[1], [0], [0], [1], [0, 0, 1, 1], [], []>} : vector<64x32xf32>, vector<32x2xf32>, vector<64x2xf32> -> vector<64x2xf32>
    %c0_36 = arith.constant 0 : index
    %c0_37 = arith.constant 0 : index
    %263 = vector.load %arg8[%c0_36, %c0_37] : memref<1x2xf32, #tpu.memory_space<vmem>>, vector<1x2xf32>
    %264 = vector.broadcast %263 : vector<1x2xf32> to vector<64x2xf32>
    %265 = arith.addf %262, %264 : vector<64x2xf32>
    %c0_38 = arith.constant 0 : index
    %c0_39 = arith.constant 0 : index
    %266 = vector.load %arg11[%c0_38, %c0_39] : memref<64x2xf32, #tpu.memory_space<vmem>>, vector<64x2xf32>
    tpu.vector_store %arg11[%c0_38, %c0_39], %265 {strides = array<i32>} : memref<64x2xf32, #tpu.memory_space<vmem>>, vector<64x2xf32>,
    %c0_40 = arith.constant 0 : index
    %c0_41 = arith.constant 0 : index
    %c0_42 = arith.constant 0 : index
    %267 = vector.load %arg12[%c0_40, %c0_41, %c0_42] : memref<2x8x32xf32, #tpu.memory_space<vmem>>, vector<1x8x32xf32>
    %268 = vector.shape_cast %267 : vector<1x8x32xf32> to vector<8x32xf32>
    %269 = vector.shape_cast %242 : vector<8x32xf32> to vector<1x8x32xf32>
    tpu.vector_store %arg12[%c0_40, %c0_41, %c0_42], %269 {strides = array<i32>} : memref<2x8x32xf32, #tpu.memory_space<vmem>>, vector<1x8x32xf32>,
    %c1 = arith.constant 1 : index
    %c0_43 = arith.constant 0 : index
    %c0_44 = arith.constant 0 : index
    %270 = vector.load %arg12[%c1, %c0_43, %c0_44] : memref<2x8x32xf32, #tpu.memory_space<vmem>>, vector<1x8x32xf32>
    %271 = vector.shape_cast %270 : vector<1x8x32xf32> to vector<8x32xf32>
    %272 = vector.shape_cast %257 : vector<8x32xf32> to vector<1x8x32xf32>
    tpu.vector_store %arg12[%c1, %c0_43, %c0_44], %272 {strides = array<i32>} : memref<2x8x32xf32, #tpu.memory_space<vmem>>, vector<1x8x32xf32>,
    %c0_45 = arith.constant 0 : index
    %c0_46 = arith.constant 0 : index
    %c0_47 = arith.constant 0 : index
    %273 = vector.load %arg13[%c0_45, %c0_46, %c0_47] : memref<2x8x32xf32, #tpu.memory_space<vmem>>, vector<1x8x32xf32>
    %274 = vector.shape_cast %273 : vector<1x8x32xf32> to vector<8x32xf32>
    %275 = vector.shape_cast %240 : vector<8x32xf32> to vector<1x8x32xf32>
    tpu.vector_store %arg13[%c0_45, %c0_46, %c0_47], %275 {strides = array<i32>} : memref<2x8x32xf32, #tpu.memory_space<vmem>>, vector<1x8x32xf32>,
    %c1_48 = arith.constant 1 : index
    %c0_49 = arith.constant 0 : index
    %c0_50 = arith.constant 0 : index
    %276 = vector.load %arg13[%c1_48, %c0_49, %c0_50] : memref<2x8x32xf32, #tpu.memory_space<vmem>>, vector<1x8x32xf32>
    %277 = vector.shape_cast %276 : vector<1x8x32xf32> to vector<8x32xf32>
    %278 = vector.shape_cast %255 : vector<8x32xf32> to vector<1x8x32xf32>
    tpu.vector_store %arg13[%c1_48, %c0_49, %c0_50], %278 {strides = array<i32>} : memref<2x8x32xf32, #tpu.memory_space<vmem>>, vector<1x8x32xf32>,
    return
  }
  func.func @transform_0(%arg0: i32) -> (i32, i32) {
    %c0_i32 = arith.constant 0 : i32
    %c0_i32_0 = arith.constant 0 : i32
    %c0_i32_1 = arith.constant 0 : i32
    return %c0_i32, %c0_i32_0 : i32, i32
  }
  func.func @transform_1(%arg0: i32) -> (i32, i32) {
    %c0_i32 = arith.constant 0 : i32
    %c0_i32_0 = arith.constant 0 : i32
    %c0_i32_1 = arith.constant 0 : i32
    return %c0_i32, %c0_i32_0 : i32, i32
  }
  func.func @transform_2(%arg0: i32) -> (i32, i32) {
    %c0_i32 = arith.constant 0 : i32
    %c0_i32_0 = arith.constant 0 : i32
    %c0_i32_1 = arith.constant 0 : i32
    return %c0_i32, %c0_i32_0 : i32, i32
  }
  func.func @transform_3(%arg0: i32) -> (i32, i32) {
    %c0_i32 = arith.constant 0 : i32
    %c0_i32_0 = arith.constant 0 : i32
    %c0_i32_1 = arith.constant 0 : i32
    return %c0_i32, %c0_i32_0 : i32, i32
  }
  func.func @transform_4(%arg0: i32) -> (i32, i32) {
    %c0_i32 = arith.constant 0 : i32
    %c0_i32_0 = arith.constant 0 : i32
    %c0_i32_1 = arith.constant 0 : i32
    return %c0_i32, %c0_i32_0 : i32, i32
  }
  func.func @transform_5(%arg0: i32) -> (i32, i32) {
    %c0_i32 = arith.constant 0 : i32
    %c0_i32_0 = arith.constant 0 : i32
    %c0_i32_1 = arith.constant 0 : i32
    return %c0_i32, %c0_i32_0 : i32, i32
  }
  func.func @transform_6(%arg0: i32) -> (i32, i32) {
    %c0_i32 = arith.constant 0 : i32
    %c0_i32_0 = arith.constant 0 : i32
    %c0_i32_1 = arith.constant 0 : i32
    return %c0_i32, %c0_i32_0 : i32, i32
  }
  func.func @transform_7(%arg0: i32) -> (i32, i32) {
    %c0_i32 = arith.constant 0 : i32
    %c0_i32_0 = arith.constant 0 : i32
    %c0_i32_1 = arith.constant 0 : i32
    return %c0_i32, %c0_i32_0 : i32, i32
  }
  func.func @transform_8(%arg0: i32) -> (i32, i32) {
    %c0_i32 = arith.constant 0 : i32
    %c0_i32_0 = arith.constant 0 : i32
    %c0_i32_1 = arith.constant 0 : i32
    return %c0_i32, %c0_i32_0 : i32, i32
  }
  func.func @transform_9(%arg0: i32) -> (i32, i32) {
    %c0_i32 = arith.constant 0 : i32
    %c0_i32_0 = arith.constant 0 : i32
    %c0_i32_1 = arith.constant 0 : i32
    return %c0_i32, %c0_i32_0 : i32, i32
  }
  func.func @transform_10(%arg0: i32) -> (i32, i32) {
    %c0_i32 = arith.constant 0 : i32
    %c0_i32_0 = arith.constant 0 : i32
    %c0_i32_1 = arith.constant 0 : i32
    return %c0_i32, %c0_i32_0 : i32, i32
  }
  func.func @transform_11(%arg0: i32) -> (i32, i32, i32) {
    %c0_i32 = arith.constant 0 : i32
    %c0_i32_0 = arith.constant 0 : i32
    %c0_i32_1 = arith.constant 0 : i32
    %c0_i32_2 = arith.constant 0 : i32
    return %c0_i32, %c0_i32_0, %c0_i32_1 : i32, i32, i32
  }
  func.func @transform_12(%arg0: i32) -> (i32, i32, i32) {
    %c0_i32 = arith.constant 0 : i32
    %c0_i32_0 = arith.constant 0 : i32
    %c0_i32_1 = arith.constant 0 : i32
    %c0_i32_2 = arith.constant 0 : i32
    return %c0_i32, %c0_i32_0, %c0_i32_1 : i32, i32, i32
  }
}

</mosaic_0001>

<bundles_post_ra>
// kernel: rad_recurrent_forward.2
= control target key start
LH: loop header
LB: loop body
LE: loop exit
PB: predicated region body
PF: predicated region fallthrough
CT: control target
= control target key end

     0   :  { %vm150_vm0 = vcmask 1041408   ;;  %v2695_v3 = vmov 0.0|0.0   ;;  %vm125_vm1 = vcmask 15360   ;;  %vm2696_vm2 = vmmov 0   ;;  %s2699_s21 = smov 32   ;;  %s3265_s0 = inlined_call_operand.vmem [shape: f32[2,128], index: 0, kind: input, shape index: {}]   ;;  %s3266_s1 = inlined_call_operand.vmem [shape: f32[32,128], index: 1, kind: input, shape index: {}]   ;;  %s3267_s2 = inlined_call_operand.vmem [shape: f32[1,128], index: 2, kind: input, shape index: {}]   ;;  %s3268_s3 = inlined_call_operand.vmem [shape: f32[64,128], index: 3, kind: input, shape index: {}]   ;;  %s3269_s4 = inlined_call_operand.vmem [shape: f32[1,128], index: 4, kind: input, shape index: {}]   ;;  %s3270_s5 = inlined_call_operand.vmem [shape: f32[32,2], index: 5, kind: input, shape index: {}]   ;;  %s3271_s6 = inlined_call_operand.vmem [shape: f32[1,2], index: 6, kind: input, shape index: {}]   ;;  %s3272_s7 = inlined_call_operand.vmem [shape: f32[1,128], index: 7, kind: input, shape index: {}]   ;;  %s3273_s8 = inlined_call_operand.vmem [shape: f32[1,128], index: 8, kind: input, shape index: {}]   ;;  %s3274_s9 = inlined_call_operand.vmem [shape: f32[8,8,2], index: 9, kind: input, shape index: {}]   ;;  %s3275_s10 = inlined_call_operand.vmem [shape: f32[64,2], index: 10, kind: output, shape index: {0}]   ;;  %s3276_s11 = inlined_call_operand.vmem [shape: f32[2,8,32], index: 11, kind: output, shape index: {1}]   ;;  %s3277_s12 = inlined_call_operand.vmem [shape: f32[2,8,32], index: 12, kind: output, shape index: {2}]  }
   0x1   :  { %v76_v0 = vld [vmem:[%s3266_s1] sm:$0xff]  ;;  %v77_v1 = vld [vmem:[%s3266_s1 + $0x8] sm:$0xff]  ;;  %2473 = vmatprep.subr.bf16.mxu1 %v2695_v3  ;;  %v78_v7 = vld [vmem:[%s3266_s1 + $0x10] sm:$0xff]  ;;  %v2697_v10 = vmov 0.0   ;;  %vm259_vm3 = vcmask 261120   ;;  %vm359_vm4 = vcmask 523264  }
   0x2   :  { %v117_v2 = vld [vmem:[%s3265_s0] sm:$0x3]  ;;  %v2776_v4 = vpack.c.bf16 %v77_v1, %v76_v0  ;;  %v2020_v6 = vld [vmem:[%s3274_s9 + $0x8] sm:$0xff]  ;;  %v79_v8 = vld [vmem:[%s3266_s1 + $0x18] sm:$0xff]  ;;  %2221 = vmatprep.mubr.msk.f32.mxu1 %vm2696_vm2, %v2697_v10 }
   0x3   :  { %2199 = vmatprep.subr.msk.mxu0 %vm150_vm0, %v117_v2  ;;  %v38_v5 = vld [vmem:[%s3274_s9] sm:$0xff]  ;;  %v2793_v9 = vpack.c.bf16 %v79_v8, %v78_v7  ;;  %v81_v29 = vld [vmem:[%s3268_s3 + $0x8] sm:$0xff]  ;;  %v2021_v30 = vld [vmem:[%s3274_s9 + $0x10] sm:$0xff] }
   0x4   :  { %2200 = vmatpush3.msk.msra.mxu0 %vm150_vm0, %v117_v2  ;;  %2201 = vmatprep.mubr.msk.f32.mxu0 %vm125_vm1, %v38_v5  ;;  %v2813_v12 = vld [vmem:[%s3267_s2] ss:$0 sm:$0xff]  ;;  %s2698_s2 = smov 64   ;;  %v2022_v32 = vld [vmem:[%s3274_s9 + $0x18] sm:$0xff]  ;;  %v82_v33 = vld [vmem:[%s3268_s3 + $0x10] sm:$0xff] }
   0x5   :  { %2475 = vmatpush3.bf16.msra.mxu1 %v2776_v4  ;;  %2202 = vmatmul.mubr.msk.f32.vlgmr.msra.gmra.mrb[0].mxu0 %vm125_vm1, %v2020_v6  ;;  %v2819_v18 = vld [vmem:[%s3272_s7] ss:$0 sm:$0xff]  ;;  %v83_v34 = vld [vmem:[%s3268_s3 + $0x18] sm:$0xff]  ;;  %v2024_v37 = vld [vmem:[%s3274_s9 + $0x28] sm:$0xff] }
   0x6   :  { %2476 = vmatprep.subr.bf16.mxu1 %v2695_v3  ;;  %2479 = vmatprep.subr.bf16.mxu0 %v2695_v3  ;;  %v2824_v20 = vld [vmem:[%s3273_s8] ss:$0 sm:$0xff]  ;;  %v2859_v36 = vpack.c.bf16 %v83_v34, %v82_v33  ;;  %v85_v39 = vld [vmem:[%s3268_s3 + $0x28] sm:$0xff]  ;;  %v2025_v40 = vld [vmem:[%s3274_s9 + $0x30] sm:$0xff] }
   0x7   :  { %v80_v28 = vld [vmem:[%s3268_s3] sm:$0xff]  ;;  %2204 = vmatprep.mubr.msk.f32.mxu0 %vm125_vm1, %v2021_v30  ;;  %v2026_v42 = vld [vmem:[%s3274_s9 + $0x38] sm:$0xff]  ;;  %v86_v43 = vld [vmem:[%s3268_s3 + $0x30] sm:$0xff] }
   0x8   :  { %v2842_v31 = vpack.c.bf16 %v81_v29, %v80_v28  ;;  %v2023_v35 = vld [vmem:[%s3274_s9 + $0x20] sm:$0xff]  ;;  %v87_v44 = vld [vmem:[%s3268_s3 + $0x38] sm:$0xff] }
   0x9   :  { %2478 = vmatpush3.bf16.msra.mxu1 %v2793_v9  ;;  %2205 = vmatmul.mubr.msk.f32.gmra.mrb[2].mxu0 %vm125_vm1, %v2022_v32  ;;  %v84_v38 = vld [vmem:[%s3268_s3 + $0x20] sm:$0xff]  ;;  %v2893_v46 = vpack.c.bf16 %v87_v44, %v86_v43 }
   0xa   :  { %2491 = vmatprep.subr.bf16.mxu1 %v2695_v3  ;;  %2481 = vmatpush3.bf16.msra.mxu0 %v2842_v31  ;;  %v2877_v41 = vpack.c.bf16 %v85_v39, %v84_v38  ;;  %v2937_v58 = vld [vmem:[%s3269_s4] ss:$0 sm:$0xff] }
   0xb   :  { %2207 = vmatprep.mubr.msk.f32.mxu0 %vm125_vm1, %v2023_v35  ;;  %2482 = vmatprep.subr.bf16.mxu0 %v2695_v3 }
   0xc   :  { %2222 = vmatmul.mubr.f32.vlgmr.msra.gmra.mrb[0].mxu1 %v2697_v10 }
   0xd   :  { %2493 = vmatpush3.bf16.msra.mxu1 %v2776_v4  ;;  %2251 = vmatprep.mubr.msk.f32.mxu1 %vm2696_vm2, %v2697_v10 }
   0xe   :  { %2494 = vmatprep.subr.bf16.mxu1 %v2695_v3  ;;  %2208 = vmatmul.mubr.msk.f32.gmra.mrb[4].mxu0 %vm125_vm1, %v2024_v37 }
   0xf   :  { %2484 = vmatpush3.bf16.msra.mxu0 %v2859_v36  ;;  %2210 = vmatprep.mubr.msk.f32.mxu0 %vm125_vm1, %v2025_v40 }
  0x10   :  { %2485 = vmatprep.subr.bf16.mxu0 %v2695_v3 }
  0x11   :  { %2496 = vmatpush3.bf16.msra.mxu1 %v2793_v9 }
  0x12   :  { %2497 = vmatprep.subr.bf16.mxu1 %v2695_v3  ;;  %2211 = vmatmul.mubr.msk.f32.gmra.mrb[6].mxu0 %vm125_vm1, %v2026_v42 }
  0x13   :  { %2487 = vmatpush3.bf16.msra.mxu0 %v2877_v41  ;;  %2240 = vmatprep.mubr.msk.f32.mxu0 %vm2696_vm2, %v2697_v10 }
  0x14   :  { %2488 = vmatprep.subr.bf16.mxu0 %v2695_v3 }
  0x17   :  { %2490 = vmatpush3.bf16.msra.mxu0 %v2893_v46 }
  0x18   :  { %2509 = vmatprep.subr.bf16.mxu0 %v2695_v3 }
  0xd8   :  { %v2808_v11 = vpop.f32.mrb[0].mxu0 }
  0xd9   :  { %v220_v13 = vpop.f32.mrb[1].mxu0  ;;  %v226_v57 = vadd.f32 %v2808_v11, %v2813_v12 }
  0xda   :  { %v221_v14 = vadd.f32 %v2813_v12, %v220_v13 }
  0xdc   :  { %v2901_v49 = vpop.f32.mrb[2].mxu0 }
  0xdd   :  { %v2903_v50 = vpop.f32.mrb[3].mxu0 }
  0xde   :  { %v231_v34 = vadd.f32 %v2813_v12, %v2903_v50 }
  0xdf   :  { %v329_v15 = vpop.f32.mrb[0].mxu1 }
  0xe0   :  { %v333_v16 = vadd.f32 %v329_v15, %v221_v14  ;;  %v2223_v17 = vpop.f32.mrb[1].mxu1 }
  0xe1   :  { %v2905_v51 = vpop.f32.mrb[4].mxu0 }
  0xe2   :  { %2631 = vtanh.f32 %v333_v16  ;;  %v2907_v52 = vpop.f32.mrb[5].mxu0 }
  0xe5   :  { %v2909_v53 = vpop.f32.mrb[6].mxu0 }
  0xe6   :  { %v2911_v54 = vpop.f32.mrb[7].mxu0 }
  0xec   :  { %v2632_v19 = vpop.eup %2631 }
  0xed   :  { %v335_v21 = vmul.f32 %v2632_v19, %v2819_v18 }
  0xef   :  { %v336_v22 = vadd.f32 %v2824_v20, %v335_v21 }
  0xf1   :  { %339 = vrot.lane.b32.xlu0 %v336_v22, %s2698_s2  ;;  %v337_v25 = vmul.f32 0.0, %v336_v22 }
 0x163   :  { %v340_v23 = vpop.permute.xlu0 %339 }
 0x164   :  { %v342_v24 = vmul.f32 %v340_v23, %v336_v22 }
 0x166   :  { %344 = vrot.lane.b32.xlu0 %v342_v24, %s2699_s21 }
 0x1d8   :  { %v345_v26 = vpop.permute.xlu0 %344 }
 0x1d9   :  { %v2830_v27 = vadd.f32 %v345_v26, %v337_v25 }
 0x1db   :  { %2633 = vtanh.f32 %v2830_v27 }
 0x1e5   :  { %v2634_v45 = vpop.eup %2633 }
 0x1e6   :  { %350 = vrot.lane.b32.xlu1 %v2634_v45, %s2698_s2 }
 0x258   :  { %v351_v47 = vpop.permute.xlu1 %350 }
 0x259   :  { %v353_v48 = vmul.f32 %v351_v47, %v336_v22 }
 0x25b   :  { %355 = vrot.lane.b32.xlu1 %v353_v48, %s2699_s21 }
 0x2cd   :  { %v356_v55 = vpop.permute.xlu1 %355 }
 0x2ce   :  { %v358_v56 = vsel %vm259_vm3, %v356_v55, 0.0  ;;  %2252 = vmatmul.mubr.msk.f32.vlgmr.msra.gmra.mrb[2].mxu1 %vm259_vm3, %v356_v55 }
 0x2cf   :  { %2241 = vmatmul.mubr.msk.f32.vlgmr.msra.gmra.mrb[8].mxu0 %vm359_vm4, %v358_v56  ;;  %2499 = vmatpush3.bf16.msra.mxu1 %v2842_v31 }
 0x2d0   :  { %2500 = vmatprep.subr.bf16.mxu1 %v2695_v3  ;;  %2511 = vmatpush3.bf16.msra.mxu0 %v2776_v4 }
 0x2d1   :  { %2512 = vmatprep.subr.bf16.mxu0 %v2695_v3  ;;  %2281 = vmatprep.mubr.msk.f32.mxu0 %vm2696_vm2, %v2697_v10 }
 0x2d2   :  { %2270 = vmatprep.mubr.msk.f32.mxu1 %vm2696_vm2, %v2697_v10 }
 0x2d3   :  { %2502 = vmatpush3.bf16.msra.mxu1 %v2859_v36 }
 0x2d4   :  { %2503 = vmatprep.subr.bf16.mxu1 %v2695_v3  ;;  %2514 = vmatpush3.bf16.msra.mxu0 %v2793_v9 }
 0x2d5   :  { %2515 = vmatprep.subr.bf16.mxu0 %v2695_v3 }
 0x2d7   :  { %2505 = vmatpush3.bf16.msra.mxu1 %v2877_v41 }
 0x2d8   :  { %2506 = vmatprep.subr.bf16.mxu1 %v2695_v3 }
 0x2db   :  { %2508 = vmatpush3.bf16.msra.mxu1 %v2893_v46 }
 0x2dc   :  { %2527 = vmatprep.subr.bf16.mxu1 %v2695_v3 }
 0x3a1   :  { %v521_v59 = vpop.f32.mrb[2].mxu1 }
 0x3a2   :  { %v525_v60 = vadd.f32 %v521_v59, %v226_v57  ;;  %v429_v61 = vpop.f32.mrb[8].mxu0  ;;  %v2253_v62 = vpop.f32.mrb[3].mxu1 }
 0x3a3   :  { %v430_v63 = vadd.f32 %v2937_v58, %v429_v61  ;;  %v2242_v0 = vpop.f32.mrb[9].mxu0 }
 0x3a4   :  { %2635 = vtanh.f32 %v525_v60 }
 0x3a5   :  { %2637 = vtanh.f32 %v430_v63 }
 0x3ae   :  { %v2636_v1 = vpop.eup %2635 }
 0x3af   :  { %v2638_v2 = vpop.eup %2637  ;;  %v527_v5 = vmul.f32 %v2636_v1, %v2819_v18 }
 0x3b0   :  { %v434_v6 = vmul.f32 %v2638_v2, %v2819_v18 }
 0x3b1   :  { %v528_v7 = vadd.f32 %v2824_v20, %v527_v5 }
 0x3b2   :  { %v435_v8 = vadd.f32 %v2824_v20, %v434_v6 }
 0x3b3   :  { %531 = vrot.lane.b32.xlu1 %v528_v7, %s2698_s2  ;;  %v529_v16 = vmul.f32 %v528_v7, %v2830_v27 }
 0x3b4   :  { %438 = vrot.lane.b32.xlu0 %v435_v8, %s2698_s2  ;;  %v436_v19 = vmul.f32 0.0, %v435_v8 }
 0x425   :  { %v532_v11 = vpop.permute.xlu1 %531 }
 0x426   :  { %v534_v13 = vmul.f32 %v532_v11, %v528_v7  ;;  %v439_v14 = vpop.permute.xlu0 %438 }
 0x427   :  { %v441_v15 = vmul.f32 %v439_v14, %v435_v8 }
 0x428   :  { %536 = vrot.lane.b32.xlu1 %v534_v13, %s2699_s21 }
 0x429   :  { %443 = vrot.lane.b32.xlu0 %v441_v15, %s2699_s21 }
 0x49a   :  { %v537_v17 = vpop.permute.xlu1 %536 }
 0x49b   :  { %v539_v21 = vadd.f32 %v537_v17, %v529_v16  ;;  %v444_v22 = vpop.permute.xlu0 %443  ;;  %v236_v16 = vadd.f32 %v2901_v49, %v2813_v12 }
 0x49c   :  { %v446_v23 = vadd.f32 %v444_v22, %v436_v19 }
 0x49d   :  { %2639 = vtanh.f32 %v539_v21 }
 0x49e   :  { %2641 = vtanh.f32 %v446_v23 }
 0x4a7   :  { %v2640_v24 = vpop.eup %2639 }
 0x4a8   :  { %v2642_v25 = vpop.eup %2641  ;;  %542 = vrot.lane.b32.xlu1 %v2640_v24, %s2698_s2 }
 0x4a9   :  { %449 = vrot.lane.b32.xlu0 %v2642_v25, %s2698_s2 }
 0x51a   :  { %v543_v26 = vpop.permute.xlu1 %542 }
 0x51b   :  { %v545_v28 = vmul.f32 %v543_v26, %v528_v7  ;;  %v450_v29 = vpop.permute.xlu0 %449 }
 0x51c   :  { %v2951_v30 = vmul.f32 %v450_v29, %v435_v8 }
 0x51d   :  { %547 = vrot.lane.b32.xlu0 %v545_v28, %s2699_s21 }
 0x51e   :  { %551 = vrot.lane.b32.xlu1 %v2951_v30, %s2698_s2 }
 0x58f   :  { %v548_v27 = vpop.permute.xlu0 %547 }
 0x590   :  { %v552_v32 = vpop.permute.xlu1 %551  ;;  %2282 = vmatmul.mubr.msk.f32.vlgmr.msra.gmra.mrb[10].mxu0 %vm259_vm3, %v548_v27 }
 0x591   :  { %v554_v33 = vsel %vm259_vm3, %v548_v27, %v552_v32  ;;  %2517 = vmatpush3.bf16.msra.mxu0 %v2842_v31  ;;  %2300 = vmatprep.mubr.msk.f32.mxu0 %vm2696_vm2, %v2697_v10 }
 0x592   :  { %2271 = vmatmul.mubr.msk.f32.vlgmr.msra.gmra.mrb[4].mxu1 %vm359_vm4, %v554_v33  ;;  %2518 = vmatprep.subr.bf16.mxu0 %v2695_v3 }
 0x593   :  { %2529 = vmatpush3.bf16.msra.mxu1 %v2776_v4  ;;  %2311 = vmatprep.mubr.msk.f32.mxu1 %vm2696_vm2, %v2697_v10 }
 0x594   :  { %2530 = vmatprep.subr.bf16.mxu1 %v2695_v3 }
 0x595   :  { %2520 = vmatpush3.bf16.msra.mxu0 %v2859_v36 }
 0x596   :  { %2521 = vmatprep.subr.bf16.mxu0 %v2695_v3 }
 0x597   :  { %2532 = vmatpush3.bf16.msra.mxu1 %v2793_v9 }
 0x598   :  { %2533 = vmatprep.subr.bf16.mxu1 %v2695_v3 }
 0x599   :  { %2523 = vmatpush3.bf16.msra.mxu0 %v2877_v41 }
 0x59a   :  { %2524 = vmatprep.subr.bf16.mxu0 %v2695_v3 }
 0x59d   :  { %2526 = vmatpush3.bf16.msra.mxu0 %v2893_v46 }
 0x59e   :  { %2545 = vmatprep.subr.bf16.mxu0 %v2695_v3 }
 0x663   :  { %v716_v35 = vpop.f32.mrb[10].mxu0 }
 0x664   :  { %v720_v37 = vadd.f32 %v716_v35, %v231_v34  ;;  %v2283_v38 = vpop.f32.mrb[11].mxu0 }
 0x665   :  { %v624_v39 = vpop.f32.mrb[4].mxu1 }
 0x666   :  { %2643 = vtanh.f32 %v720_v37  ;;  %v625_v40 = vadd.f32 %v2937_v58, %v624_v39  ;;  %v2272_v42 = vpop.f32.mrb[5].mxu1 }
 0x668   :  { %2645 = vtanh.f32 %v625_v40 }
 0x670   :  { %v2644_v43 = vpop.eup %2643 }
 0x671   :  { %v722_v44 = vmul.f32 %v2644_v43, %v2819_v18 }
 0x672   :  { %v2646_v45 = vpop.eup %2645 }
 0x673   :  { %v723_v47 = vadd.f32 %v2824_v20, %v722_v44  ;;  %v629_v48 = vmul.f32 %v2646_v45, %v2819_v18 }
 0x675   :  { %726 = vrot.lane.b32.xlu1 %v723_v47, %s2698_s2  ;;  %v630_v50 = vadd.f32 %v2824_v20, %v629_v48  ;;  %v724_v60 = vmul.f32 %v723_v47, %v539_v21 }
 0x677   :  { %633 = vrot.lane.b32.xlu0 %v630_v50, %s2698_s2  ;;  %v631_v63 = vmul.f32 %v630_v50, %v446_v23 }
 0x6e7   :  { %v727_v55 = vpop.permute.xlu1 %726 }
 0x6e8   :  { %v729_v56 = vmul.f32 %v727_v55, %v723_v47 }
 0x6e9   :  { %v634_v57 = vpop.permute.xlu0 %633 }
 0x6ea   :  { %v636_v59 = vmul.f32 %v634_v57, %v630_v50  ;;  %731 = vrot.lane.b32.xlu1 %v729_v56, %s2699_s21 }
 0x6ec   :  { %638 = vrot.lane.b32.xlu0 %v636_v59, %s2699_s21 }
 0x75c   :  { %v732_v61 = vpop.permute.xlu1 %731 }
 0x75d   :  { %v734_v62 = vadd.f32 %v732_v61, %v724_v60  ;;  %v241_v60 = vadd.f32 %v2813_v12, %v2907_v52 }
 0x75e   :  { %v639_v0 = vpop.permute.xlu0 %638 }
 0x75f   :  { %2647 = vtanh.f32 %v734_v62  ;;  %v641_v1 = vadd.f32 %v639_v0, %v631_v63 }
 0x761   :  { %2649 = vtanh.f32 %v641_v1 }
 0x769   :  { %v2648_v2 = vpop.eup %2647 }
 0x76a   :  { %737 = vrot.lane.b32.xlu1 %v2648_v2, %s2698_s2 }
 0x76b   :  { %v2650_v5 = vpop.eup %2649 }
 0x76c   :  { %644 = vrot.lane.b32.xlu0 %v2650_v5, %s2698_s2 }
 0x7dc   :  { %v738_v6 = vpop.permute.xlu1 %737 }
 0x7dd   :  { %v740_v7 = vmul.f32 %v738_v6, %v723_v47 }
 0x7de   :  { %v645_v8 = vpop.permute.xlu0 %644 }
 0x7df   :  { %v2988_v11 = vmul.f32 %v645_v8, %v630_v50  ;;  %742 = vrot.lane.b32.xlu0 %v740_v7, %s2699_s21 }
 0x7e1   :  { %746 = vrot.lane.b32.xlu1 %v2988_v11, %s2698_s2 }
 0x851   :  { %v743_v13 = vpop.permute.xlu0 %742 }
 0x852   :  { %2312 = vmatmul.mubr.msk.f32.vlgmr.msra.gmra.mrb[6].mxu1 %vm259_vm3, %v743_v13 }
 0x853   :  { %v747_v14 = vpop.permute.xlu1 %746  ;;  %2535 = vmatpush3.bf16.msra.mxu1 %v2842_v31  ;;  %2330 = vmatprep.mubr.msk.f32.mxu1 %vm2696_vm2, %v2697_v10 }
 0x854   :  { %v749_v15 = vsel %vm259_vm3, %v743_v13, %v747_v14  ;;  %2536 = vmatprep.subr.bf16.mxu1 %v2695_v3 }
 0x855   :  { %2301 = vmatmul.mubr.msk.f32.vlgmr.msra.gmra.mrb[12].mxu0 %vm359_vm4, %v749_v15 }
 0x856   :  { %2547 = vmatpush3.bf16.msra.mxu0 %v2776_v4  ;;  %2341 = vmatprep.mubr.msk.f32.mxu0 %vm2696_vm2, %v2697_v10 }
 0x857   :  { %2538 = vmatpush3.bf16.msra.mxu1 %v2859_v36  ;;  %2548 = vmatprep.subr.bf16.mxu0 %v2695_v3 }
 0x858   :  { %2539 = vmatprep.subr.bf16.mxu1 %v2695_v3 }
 0x85a   :  { %2550 = vmatpush3.bf16.msra.mxu0 %v2793_v9 }
 0x85b   :  { %2541 = vmatpush3.bf16.msra.mxu1 %v2877_v41  ;;  %2551 = vmatprep.subr.bf16.mxu0 %v2695_v3 }
 0x85c   :  { %2542 = vmatprep.subr.bf16.mxu1 %v2695_v3 }
 0x85f   :  { %2544 = vmatpush3.bf16.msra.mxu1 %v2893_v46 }
 0x860   :  { %2563 = vmatprep.subr.bf16.mxu1 %v2695_v3 }
 0x925   :  { %v911_v17 = vpop.f32.mrb[6].mxu1 }
 0x926   :  { %v915_v19 = vadd.f32 %v911_v17, %v236_v16  ;;  %v2313_v21 = vpop.f32.mrb[7].mxu1 }
 0x928   :  { %2651 = vtanh.f32 %v915_v19  ;;  %v819_v22 = vpop.f32.mrb[12].mxu0 }
 0x929   :  { %v820_v23 = vadd.f32 %v2937_v58, %v819_v22  ;;  %v2302_v24 = vpop.f32.mrb[13].mxu0 }
 0x92b   :  { %2653 = vtanh.f32 %v820_v23 }
 0x932   :  { %v2652_v25 = vpop.eup %2651 }
 0x933   :  { %v917_v26 = vmul.f32 %v2652_v25, %v2819_v18 }
 0x935   :  { %v2654_v28 = vpop.eup %2653  ;;  %v918_v29 = vadd.f32 %v2824_v20, %v917_v26 }
 0x936   :  { %v824_v27 = vmul.f32 %v2654_v28, %v2819_v18 }
 0x937   :  { %921 = vrot.lane.b32.xlu1 %v918_v29, %s2698_s2  ;;  %v919_v37 = vmul.f32 %v918_v29, %v734_v62 }
 0x938   :  { %v825_v49 = vadd.f32 %v2824_v20, %v824_v27 }
 0x93a   :  { %828 = vrot.lane.b32.xlu0 %v825_v49, %s2698_s2  ;;  %v826_v40 = vmul.f32 %v825_v49, %v641_v1 }
 0x9a9   :  { %v922_v32 = vpop.permute.xlu1 %921 }
 0x9aa   :  { %v924_v33 = vmul.f32 %v922_v32, %v918_v29 }
 0x9ac   :  { %926 = vrot.lane.b32.xlu1 %v924_v33, %s2699_s21  ;;  %v829_v34 = vpop.permute.xlu0 %828 }
 0x9ad   :  { %v831_v35 = vmul.f32 %v829_v34, %v825_v49 }
 0x9af   :  { %833 = vrot.lane.b32.xlu0 %v831_v35, %s2699_s21 }
 0xa1e   :  { %v927_v38 = vpop.permute.xlu1 %926 }
 0xa1f   :  { %v929_v39 = vadd.f32 %v927_v38, %v919_v37  ;;  %v246_v37 = vadd.f32 %v2905_v51, %v2813_v12 }
 0xa21   :  { %2655 = vtanh.f32 %v929_v39  ;;  %v834_v42 = vpop.permute.xlu0 %833 }
 0xa22   :  { %v836_v43 = vadd.f32 %v834_v42, %v826_v40 }
 0xa24   :  { %2657 = vtanh.f32 %v836_v43 }
 0xa2b   :  { %v2656_v44 = vpop.eup %2655 }
 0xa2c   :  { %932 = vrot.lane.b32.xlu1 %v2656_v44, %s2698_s2 }
 0xa2e   :  { %v2658_v45 = vpop.eup %2657 }
 0xa2f   :  { %839 = vrot.lane.b32.xlu0 %v2658_v45, %s2698_s2 }
 0xa9e   :  { %v933_v47 = vpop.permute.xlu1 %932 }
 0xa9f   :  { %v935_v48 = vmul.f32 %v933_v47, %v918_v29 }
 0xaa1   :  { %937 = vrot.lane.b32.xlu0 %v935_v48, %s2699_s21  ;;  %v840_v50 = vpop.permute.xlu0 %839 }
 0xaa2   :  { %v3026_v55 = vmul.f32 %v840_v50, %v825_v49 }
 0xaa4   :  { %941 = vrot.lane.b32.xlu1 %v3026_v55, %s2698_s2 }
 0xb13   :  { %v938_v56 = vpop.permute.xlu0 %937 }
 0xb14   :  { %2342 = vmatmul.mubr.msk.f32.vlgmr.msra.gmra.mrb[14].mxu0 %vm259_vm3, %v938_v56 }
 0xb15   :  { %2553 = vmatpush3.bf16.msra.mxu0 %v2842_v31  ;;  %2360 = vmatprep.mubr.msk.f32.mxu0 %vm2696_vm2, %v2697_v10 }
 0xb16   :  { %v942_v57 = vpop.permute.xlu1 %941  ;;  %2554 = vmatprep.subr.bf16.mxu0 %v2695_v3 }
 0xb17   :  { %v944_v59 = vsel %vm259_vm3, %v938_v56, %v942_v57 }
 0xb18   :  { %2331 = vmatmul.mubr.msk.f32.vlgmr.msra.gmra.mrb[8].mxu1 %vm359_vm4, %v944_v59 }
 0xb19   :  { %2565 = vmatpush3.bf16.msra.mxu1 %v2776_v4  ;;  %2556 = vmatpush3.bf16.msra.mxu0 %v2859_v36 }
 0xb1a   :  { %2566 = vmatprep.subr.bf16.mxu1 %v2695_v3  ;;  %2557 = vmatprep.subr.bf16.mxu0 %v2695_v3 }
 0xb1b   :  { %2371 = vmatprep.mubr.msk.f32.mxu1 %vm2696_vm2, %v2697_v10 }
 0xb1d   :  { %2568 = vmatpush3.bf16.msra.mxu1 %v2793_v9  ;;  %2559 = vmatpush3.bf16.msra.mxu0 %v2877_v41 }
 0xb1e   :  { %2560 = vmatprep.subr.bf16.mxu0 %v2695_v3  ;;  %2569 = vmatprep.subr.bf16.mxu1 %v2695_v3 }
 0xb21   :  { %2562 = vmatpush3.bf16.msra.mxu0 %v2893_v46 }
 0xb22   :  { %2581 = vmatprep.subr.bf16.mxu0 %v2695_v3 }
 0xbe7   :  { %v1106_v61 = vpop.f32.mrb[14].mxu0 }
 0xbe8   :  { %v1110_v62 = vadd.f32 %v1106_v61, %v241_v60  ;;  %v2343_v63 = vpop.f32.mrb[15].mxu0 }
 0xbea   :  { %2659 = vtanh.f32 %v1110_v62 }
 0xbeb   :  { %v1014_v0 = vpop.f32.mrb[8].mxu1 }
 0xbec   :  { %v1015_v1 = vadd.f32 %v2937_v58, %v1014_v0  ;;  %v2332_v2 = vpop.f32.mrb[9].mxu1 }
 0xbee   :  { %2661 = vtanh.f32 %v1015_v1 }
 0xbf4   :  { %v2660_v5 = vpop.eup %2659 }
 0xbf5   :  { %v1112_v6 = vmul.f32 %v2660_v5, %v2819_v18 }
 0xbf7   :  { %v1113_v7 = vadd.f32 %v2824_v20, %v1112_v6 }
 0xbf8   :  { %v2662_v8 = vpop.eup %2661 }
 0xbf9   :  { %1116 = vrot.lane.b32.xlu1 %v1113_v7, %s2698_s2  ;;  %v1019_v13 = vmul.f32 %v2662_v8, %v2819_v18  ;;  %v1114_v19 = vmul.f32 %v1113_v7, %v929_v39 }
 0xbfb   :  { %v1020_v52 = vadd.f32 %v2824_v20, %v1019_v13 }
 0xbfd   :  { %1023 = vrot.lane.b32.xlu0 %v1020_v52, %s2698_s2  ;;  %v1021_v23 = vmul.f32 %v1020_v52, %v836_v43 }
 0xc6b   :  { %v1117_v14 = vpop.permute.xlu1 %1116 }
 0xc6c   :  { %v1119_v15 = vmul.f32 %v1117_v14, %v1113_v7 }
 0xc6e   :  { %1121 = vrot.lane.b32.xlu1 %v1119_v15, %s2699_s21 }
 0xc6f   :  { %v1024_v16 = vpop.permute.xlu0 %1023 }
 0xc70   :  { %v1026_v17 = vmul.f32 %v1024_v16, %v1020_v52 }
 0xc72   :  { %1028 = vrot.lane.b32.xlu0 %v1026_v17, %s2699_s21 }
 0xce0   :  { %v1122_v21 = vpop.permute.xlu1 %1121 }
 0xce1   :  { %v1124_v22 = vadd.f32 %v1122_v21, %v1114_v19  ;;  %v251_v19 = vadd.f32 %v2813_v12, %v2911_v54 }
 0xce3   :  { %2663 = vtanh.f32 %v1124_v22 }
 0xce4   :  { %v1029_v24 = vpop.permute.xlu0 %1028 }
 0xce5   :  { %v1031_v25 = vadd.f32 %v1029_v24, %v1021_v23 }
 0xce7   :  { %2665 = vtanh.f32 %v1031_v25 }
 0xced   :  { %v2664_v26 = vpop.eup %2663 }
 0xcee   :  { %1127 = vrot.lane.b32.xlu1 %v2664_v26, %s2698_s2 }
 0xcf1   :  { %v2666_v28 = vpop.eup %2665 }
 0xcf2   :  { %1034 = vrot.lane.b32.xlu0 %v2666_v28, %s2698_s2 }
 0xd60   :  { %v1128_v29 = vpop.permute.xlu1 %1127 }
 0xd61   :  { %v1130_v27 = vmul.f32 %v1128_v29, %v1113_v7 }
 0xd63   :  { %1132 = vrot.lane.b32.xlu0 %v1130_v27, %s2699_s21 }
 0xd64   :  { %v1035_v49 = vpop.permute.xlu0 %1034 }
 0xd65   :  { %v3063_v32 = vmul.f32 %v1035_v49, %v1020_v52 }
 0xd67   :  { %1136 = vrot.lane.b32.xlu1 %v3063_v32, %s2698_s2 }
 0xdd5   :  { %v1133_v33 = vpop.permute.xlu0 %1132 }
 0xdd6   :  { %2372 = vmatmul.mubr.msk.f32.vlgmr.msra.gmra.mrb[10].mxu1 %vm259_vm3, %v1133_v33 }
 0xdd7   :  { %2571 = vmatpush3.bf16.msra.mxu1 %v2842_v31  ;;  %2390 = vmatprep.mubr.msk.f32.mxu1 %vm2696_vm2, %v2697_v10 }
 0xdd8   :  { %2572 = vmatprep.subr.bf16.mxu1 %v2695_v3 }
 0xdd9   :  { %v1137_v34 = vpop.permute.xlu1 %1136 }
 0xdda   :  { %v1139_v35 = vsel %vm259_vm3, %v1133_v33, %v1137_v34 }
 0xddb   :  { %2361 = vmatmul.mubr.msk.f32.vlgmr.msra.gmra.mrb[16].mxu0 %vm359_vm4, %v1139_v35  ;;  %2574 = vmatpush3.bf16.msra.mxu1 %v2859_v36 }
 0xddc   :  { %2583 = vmatpush3.bf16.msra.mxu0 %v2776_v4  ;;  %2575 = vmatprep.subr.bf16.mxu1 %v2695_v3 }
 0xddd   :  { %2584 = vmatprep.subr.bf16.mxu0 %v2695_v3  ;;  %2401 = vmatprep.mubr.msk.f32.mxu0 %vm2696_vm2, %v2697_v10 }
 0xddf   :  { %2577 = vmatpush3.bf16.msra.mxu1 %v2877_v41 }
 0xde0   :  { %2586 = vmatpush3.bf16.msra.mxu0 %v2793_v9  ;;  %2578 = vmatprep.subr.bf16.mxu1 %v2695_v3 }
 0xde1   :  { %2587 = vmatprep.subr.bf16.mxu0 %v2695_v3 }
 0xde3   :  { %2580 = vmatpush3.bf16.msra.mxu1 %v2893_v46 }
 0xde4   :  { %2599 = vmatprep.subr.bf16.mxu1 %v2695_v3 }
 0xea9   :  { %v1301_v38 = vpop.f32.mrb[10].mxu1 }
 0xeaa   :  { %v1305_v39 = vadd.f32 %v1301_v38, %v246_v37  ;;  %v2373_v40 = vpop.f32.mrb[11].mxu1 }
 0xeac   :  { %2667 = vtanh.f32 %v1305_v39 }
 0xeae   :  { %v1209_v42 = vpop.f32.mrb[16].mxu0 }
 0xeaf   :  { %v1210_v43 = vadd.f32 %v2937_v58, %v1209_v42  ;;  %v2362_v44 = vpop.f32.mrb[17].mxu0 }
 0xeb1   :  { %2669 = vtanh.f32 %v1210_v43 }
 0xeb6   :  { %v2668_v45 = vpop.eup %2667 }
 0xeb7   :  { %v1307_v47 = vmul.f32 %v2668_v45, %v2819_v18 }
 0xeb9   :  { %v1308_v48 = vadd.f32 %v2824_v20, %v1307_v47 }
 0xebb   :  { %v2670_v50 = vpop.eup %2669  ;;  %1311 = vrot.lane.b32.xlu1 %v1308_v48, %s2698_s2  ;;  %v1309_v62 = vmul.f32 %v1308_v48, %v1124_v22 }
 0xebc   :  { %v1214_v56 = vmul.f32 %v2670_v50, %v2819_v18 }
 0xebe   :  { %v1215_v51 = vadd.f32 %v2824_v20, %v1214_v56 }
 0xec0   :  { %1218 = vrot.lane.b32.xlu0 %v1215_v51, %s2698_s2  ;;  %v1216_v1 = vmul.f32 %v1215_v51, %v1031_v25 }
 0xf2d   :  { %v1312_v57 = vpop.permute.xlu1 %1311 }
 0xf2e   :  { %v1314_v59 = vmul.f32 %v1312_v57, %v1308_v48 }
 0xf30   :  { %1316 = vrot.lane.b32.xlu1 %v1314_v59, %s2699_s21 }
 0xf32   :  { %v1219_v60 = vpop.permute.xlu0 %1218 }
 0xf33   :  { %v1221_v61 = vmul.f32 %v1219_v60, %v1215_v51 }
 0xf35   :  { %1223 = vrot.lane.b32.xlu0 %v1221_v61, %s2699_s21 }
 0xfa2   :  { %v1317_v63 = vpop.permute.xlu1 %1316 }
 0xfa3   :  { %v1319_v0 = vadd.f32 %v1317_v63, %v1309_v62 }
 0xfa5   :  { %2671 = vtanh.f32 %v1319_v0 }
 0xfa7   :  { %v1224_v2 = vpop.permute.xlu0 %1223 }
 0xfa8   :  { %v1226_v5 = vadd.f32 %v1224_v2, %v1216_v1 }
 0xfaa   :  { %2673 = vtanh.f32 %v1226_v5 }
 0xfaf   :  { %v2672_v6 = vpop.eup %2671 }
 0xfb0   :  { %1322 = vrot.lane.b32.xlu1 %v2672_v6, %s2698_s2 }
 0xfb4   :  { %v2674_v7 = vpop.eup %2673 }
 0xfb5   :  { %1229 = vrot.lane.b32.xlu0 %v2674_v7, %s2698_s2 }
0x1022   :  { %v1323_v8 = vpop.permute.xlu1 %1322 }
0x1023   :  { %v1325_v13 = vmul.f32 %v1323_v8, %v1308_v48 }
0x1025   :  { %1327 = vrot.lane.b32.xlu0 %v1325_v13, %s2699_s21 }
0x1027   :  { %v1230_v52 = vpop.permute.xlu0 %1229 }
0x1028   :  { %v3100_v14 = vmul.f32 %v1230_v52, %v1215_v51 }
0x102a   :  { %1331 = vrot.lane.b32.xlu1 %v3100_v14, %s2698_s2 }
0x1097   :  { %v1328_v15 = vpop.permute.xlu0 %1327 }
0x1098   :  { %2402 = vmatmul.mubr.msk.f32.vlgmr.msra.gmra.mrb[18].mxu0 %vm259_vm3, %v1328_v15 }
0x1099   :  { %2589 = vmatpush3.bf16.msra.mxu0 %v2842_v31  ;;  %2420 = vmatprep.mubr.msk.f32.mxu0 %vm2696_vm2, %v2697_v10 }
0x109a   :  { %2590 = vmatprep.subr.bf16.mxu0 %v2695_v3 }
0x109c   :  { %v1332_v16 = vpop.permute.xlu1 %1331 }
0x109d   :  { %v1334_v17 = vsel %vm259_vm3, %v1328_v15, %v1332_v16  ;;  %2592 = vmatpush3.bf16.msra.mxu0 %v2859_v36 }
0x109e   :  { %2391 = vmatmul.mubr.msk.f32.vlgmr.msra.gmra.mrb[12].mxu1 %vm359_vm4, %v1334_v17  ;;  %2593 = vmatprep.subr.bf16.mxu0 %v2695_v3 }
0x109f   :  { %2601 = vmatpush3.bf16.msra.mxu1 %v2776_v4  ;;  %2431 = vmatprep.mubr.msk.f32.mxu1 %vm2696_vm2, %v2697_v10 }
0x10a0   :  { %2602 = vmatprep.subr.bf16.mxu1 %v2695_v3 }
0x10a1   :  { %2595 = vmatpush3.bf16.msra.mxu0 %v2877_v41 }
0x10a2   :  { %2596 = vmatprep.subr.bf16.mxu0 %v2695_v3 }
0x10a3   :  { %2604 = vmatpush3.bf16.msra.mxu1 %v2793_v9 }
0x10a4   :  { %2605 = vmatprep.subr.bf16.mxu1 %v2695_v3 }
0x10a5   :  { %2598 = vmatpush3.bf16.msra.mxu0 %v2893_v46 }
0x116b   :  { %v1496_v21 = vpop.f32.mrb[18].mxu0 }
0x116c   :  { %v1500_v4 = vadd.f32 %v1496_v21, %v251_v19  ;;  %v2403_v22 = vpop.f32.mrb[19].mxu0 }
0x116e   :  { %2675 = vtanh.f32 %v1500_v4 }
0x1171   :  { %v1404_v23 = vpop.f32.mrb[12].mxu1 }
0x1172   :  { %v1405_v24 = vadd.f32 %v2937_v58, %v1404_v23  ;;  %v2392_v25 = vpop.f32.mrb[13].mxu1 }
0x1174   :  { %2677 = vtanh.f32 %v1405_v24 }
0x1178   :  { %v2676_v26 = vpop.eup %2675 }
0x1179   :  { %v1502_v28 = vmul.f32 %v2676_v26, %v2819_v18 }
0x117b   :  { %v1503_v9 = vadd.f32 %v2824_v20, %v1502_v28 }
0x117d   :  { %1506 = vrot.lane.b32.xlu1 %v1503_v9, %s2698_s2  ;;  %v1504_v37 = vmul.f32 %v1503_v9, %v1319_v0 }
0x117e   :  { %v2678_v29 = vpop.eup %2677 }
0x117f   :  { %v1409_v27 = vmul.f32 %v2678_v29, %v2819_v18 }
0x1181   :  { %v1410_v54 = vadd.f32 %v2824_v20, %v1409_v27 }
0x1183   :  { %1413 = vrot.lane.b32.xlu0 %v1410_v54, %s2698_s2  ;;  %v1411_v40 = vmul.f32 %v1410_v54, %v1226_v5 }
0x11ef   :  { %v1507_v49 = vpop.permute.xlu1 %1506 }
0x11f0   :  { %v1509_v33 = vmul.f32 %v1507_v49, %v1503_v9 }
0x11f2   :  { %1511 = vrot.lane.b32.xlu1 %v1509_v33, %s2699_s21 }
0x11f5   :  { %v1414_v34 = vpop.permute.xlu0 %1413 }
0x11f6   :  { %v1416_v35 = vmul.f32 %v1414_v34, %v1410_v54 }
0x11f8   :  { %1418 = vrot.lane.b32.xlu0 %v1416_v35, %s2699_s21  ;;  %v1818_v35 = vmax.f32 %v2951_v30, 0.0 }
0x1264   :  { %v1512_v38 = vpop.permute.xlu1 %1511 }
0x1265   :  { %v1514_v39 = vadd.f32 %v1512_v38, %v1504_v37  ;;  %v1820_v37 = vmax.f32 %v3026_v55, 0.0  ;;  %v1828_v55 = vld [vmem:[%s3270_s5 + $0x10] sm:$0xff] }
0x1267   :  { %2679 = vtanh.f32 %v1514_v39 }
0x126a   :  { %v1419_v42 = vpop.permute.xlu0 %1418 }
0x126b   :  { %v1421_v43 = vadd.f32 %v1419_v42, %v1411_v40 }
0x126d   :  { %2681 = vtanh.f32 %v1421_v43 }
0x1271   :  { %v2680_v44 = vpop.eup %2679 }
0x1272   :  { %1517 = vrot.lane.b32.xlu1 %v2680_v44, %s2698_s2 }
0x1277   :  { %v2682_v45 = vpop.eup %2681 }
0x1278   :  { %1424 = vrot.lane.b32.xlu0 %v2682_v45, %s2698_s2 }
0x12e4   :  { %v1518_v47 = vpop.permute.xlu1 %1517 }
0x12e5   :  { %v1520_v48 = vmul.f32 %v1518_v47, %v1503_v9  ;;  %v1819_v47 = vmax.f32 %v2988_v11, 0.0 }
0x12e7   :  { %1522 = vrot.lane.b32.xlu0 %v1520_v48, %s2699_s21  ;;  %v1821_v48 = vmax.f32 %v3063_v32, 0.0 }
0x12ea   :  { %v1425_v50 = vpop.permute.xlu0 %1424 }
0x12eb   :  { %v3136_v56 = vmul.f32 %v1425_v50, %v1410_v54 }
0x12ed   :  { %1526 = vrot.lane.b32.xlu1 %v3136_v56, %s2698_s2  ;;  %v1823_v50 = vmax.f32 %v3136_v56, 0.0 }
0x1359   :  { %v1523_v51 = vpop.permute.xlu0 %1522 }
0x135a   :  { %2432 = vmatmul.mubr.msk.f32.vlgmr.msra.gmra.mrb[14].mxu1 %vm259_vm3, %v1523_v51 }
0x135b   :  { %2607 = vmatpush3.bf16.msra.mxu1 %v2842_v31  ;;  %2450 = vmatprep.mubr.msk.f32.mxu1 %vm2696_vm2, %v2697_v10  ;;  %v256_v10 = vadd.f32 %v2909_v53, %v2813_v12 }
0x135c   :  { %2608 = vmatprep.subr.bf16.mxu1 %v2695_v3 }
0x135f   :  { %v1527_v57 = vpop.permute.xlu1 %1526  ;;  %2610 = vmatpush3.bf16.msra.mxu1 %v2859_v36 }
0x1360   :  { %v1529_v59 = vsel %vm259_vm3, %v1523_v51, %v1527_v57  ;;  %2611 = vmatprep.subr.bf16.mxu1 %v2695_v3 }
0x1361   :  { %2421 = vmatmul.mubr.msk.f32.vlgmr.msra.gmra.mrb[20].mxu0 %vm359_vm4, %v1529_v59 }
0x1363   :  { %2613 = vmatpush3.bf16.msra.mxu1 %v2877_v41 }
0x1364   :  { %2614 = vmatprep.subr.bf16.mxu1 %v2695_v3 }
0x1367   :  { %2616 = vmatpush3.bf16.msra.mxu1 %v2893_v46 }
0x142d   :  { %v1691_v31 = vpop.f32.mrb[14].mxu1 }
0x142e   :  { %v1695_v60 = vadd.f32 %v1691_v31, %v256_v10  ;;  %v2433_v61 = vpop.f32.mrb[15].mxu1 }
0x1430   :  { %2683 = vtanh.f32 %v1695_v60 }
0x1434   :  { %v1599_v36 = vpop.f32.mrb[20].mxu0 }
0x1435   :  { %v1600_v62 = vadd.f32 %v2937_v58, %v1599_v36  ;;  %v2422_v63 = vpop.f32.mrb[21].mxu0 }
0x1437   :  { %2685 = vtanh.f32 %v1600_v62 }
0x143a   :  { %v2684_v0 = vpop.eup %2683 }
0x143b   :  { %v1697_v1 = vmul.f32 %v2684_v0, %v2819_v18  ;;  %v2055_v0 = vld [vmem:[%s3271_s6] ss:$0 sm:$0xff] }
0x143d   :  { %v1698_v41 = vadd.f32 %v2824_v20, %v1697_v1 }
0x143f   :  { %1701 = vrot.lane.b32.xlu1 %v1698_v41, %s2698_s2  ;;  %v1699_v7 = vmul.f32 %v1698_v41, %v1514_v39 }
0x1441   :  { %v2686_v3 = vpop.eup %2685 }
0x1442   :  { %v1604_v46 = vmul.f32 %v2686_v3, %v2819_v18 }
0x1444   :  { %v1605_v12 = vadd.f32 %v2824_v20, %v1604_v46 }
0x1446   :  { %1608 = vrot.lane.b32.xlu0 %v1605_v12, %s2698_s2  ;;  %v1606_v52 = vmul.f32 %v1605_v12, %v1421_v43 }
0x14b1   :  { %v1702_v53 = vpop.permute.xlu1 %1701 }
0x14b2   :  { %v1704_v2 = vmul.f32 %v1702_v53, %v1698_v41 }
0x14b4   :  { %1706 = vrot.lane.b32.xlu1 %v1704_v2, %s2699_s21 }
0x14b8   :  { %v1609_v5 = vpop.permute.xlu0 %1608 }
0x14b9   :  { %v1611_v6 = vmul.f32 %v1609_v5, %v1605_v12 }
0x14bb   :  { %1613 = vrot.lane.b32.xlu0 %v1611_v6, %s2699_s21 }
0x1526   :  { %v1707_v8 = vpop.permute.xlu1 %1706 }
0x1527   :  { %v3163_v13 = vadd.f32 %v1707_v8, %v1699_v7 }
0x1529   :  { %2687 = vtanh.f32 %v3163_v13 }
0x152d   :  { %v1614_v15 = vpop.permute.xlu0 %1613 }
0x152e   :  { %v1616_v16 = vadd.f32 %v1614_v15, %v1606_v52 }
0x1530   :  { %2689 = vtanh.f32 %v1616_v16 }
0x1533   :  { %v2688_v17 = vpop.eup %2687 }
0x1534   :  { %1712 = vrot.lane.b32.xlu1 %v2688_v17, %s2698_s2 }
0x153a   :  { %v2690_v19 = vpop.eup %2689 }
0x153b   :  { %1619 = vrot.lane.b32.xlu0 %v2690_v19, %s2698_s2 }
0x15a6   :  { %v1713_v21 = vpop.permute.xlu1 %1712 }
0x15a7   :  { %v1715_v4 = vmul.f32 %v1713_v21, %v1698_v41 }
0x15a9   :  { %1717 = vrot.lane.b32.xlu0 %v1715_v4, %s2699_s21 }
0x15ad   :  { %v1620_v22 = vpop.permute.xlu0 %1619 }
0x15ae   :  { %v1622_v23 = vmul.f32 %v1620_v22, %v1605_v12 }
0x15b0   :  { %1721 = vrot.lane.b32.xlu1 %v1622_v23, %s2698_s2  ;;  %v1824_v30 = vmax.f32 %v1622_v23, 0.0 }
0x161b   :  { %v1718_v24 = vpop.permute.xlu0 %1717 }
0x161c   :  { %1990 = vst.msk [vmem:[%s3276_s11] sm:$0xff] %vm259_vm3, %v1718_v24 }
0x1622   :  { %v1722_v25 = vpop.permute.xlu1 %1721 }
0x1623   :  { %v1724_v26 = vsel %vm259_vm3, %v1718_v24, %v1722_v25 }
0x1624   :  { %2451 = vmatmul.mubr.msk.f32.vlgmr.msra.gmra.mrb[16].mxu1 %vm359_vm4, %v1724_v26 }
0x16f7   :  { %v1794_v28 = vpop.f32.mrb[16].mxu1 }
0x16f8   :  { %v1795_v9 = vadd.f32 %v2937_v58, %v1794_v28  ;;  %v2452_v29 = vpop.f32.mrb[17].mxu1  ;;  %v1822_v58 = vmax.f32 %v3100_v14, 0.0  ;;  %v1829_v14 = vld [vmem:[%s3270_s5 + $0x18] sm:$0xff] }
0x16f9   :  { %v2621_v40 = vpack.c.bf16 %v1829_v14, %v1828_v55 }
0x16fa   :  { %2691 = vtanh.f32 %v1795_v9 }
0x1704   :  { %v2692_v27 = vpop.eup %2691 }
0x1705   :  { %v1799_v54 = vmul.f32 %v2692_v27, %v2819_v18  ;;  %v1826_v18 = vld [vmem:[%s3270_s5] sm:$0xff] }
0x1707   :  { %v1800_v49 = vadd.f32 %v2824_v20, %v1799_v54  ;;  %v1827_v20 = vld [vmem:[%s3270_s5 + $0x8] sm:$0xff]  ;;  %s2700_s5 = smov 96  }
0x1708   :  { %v2617_v38 = vpack.c.bf16 %v1827_v20, %v1826_v18 }
0x1709   :  { %1803 = vrot.lane.b32.xlu0 %v1800_v49, %s2698_s2  ;;  %v1801_v39 = vmul.f32 %v1800_v49, %v1616_v16 }
0x170a   :  { %2618 = vmatprep.subr.bf16.mxu0 %v2617_v38 }
0x170b   :  { %2620 = vmatpush3.bf16.msra.mxu0 %v2617_v38 }
0x170c   :  { %2622 = vmatprep.subr.bf16.mxu0 %v2621_v40 }
0x170f   :  { %2624 = vmatpush3.bf16.msra.mxu0 %v2621_v40 }
0x177b   :  { %v1804_v33 = vpop.permute.xlu0 %1803 }
0x177c   :  { %v1806_v34 = vmul.f32 %v1804_v33, %v1800_v49 }
0x177e   :  { %1808 = vrot.lane.b32.xlu1 %v1806_v34, %s2699_s21 }
0x1782   :  { %1845 = vrot.lane.b32.xlu1 %v1818_v35, %s2699_s21 }
0x1786   :  { %1849 = vrot.lane.b32.xlu1 %v1820_v37, %s2699_s21 }
0x178a   :  { %1853 = vrot.lane.b32.xlu1 %v1822_v58, %s2699_s21 }
0x178e   :  { %1857 = vrot.lane.b32.xlu1 %v1824_v30, %s2699_s21 }
0x17f0   :  { %v1809_v42 = vpop.permute.xlu1 %1808 }
0x17f1   :  { %v1811_v43 = vadd.f32 %v1809_v42, %v1801_v39 }
0x17f3   :  { %2693 = vtanh.f32 %v1811_v43 }
0x17f4   :  { %v1846_v44 = vpop.permute.xlu1 %1845 }
0x17f5   :  { %2461 = vmatprep.mubr.msk.f32.mxu0 %vm259_vm3, %v1846_v44 }
0x17f8   :  { %v1850_v57 = vpop.permute.xlu1 %1849 }
0x17fc   :  { %v1854_v11 = vpop.permute.xlu1 %1853 }
0x17fd   :  { %v2694_v45 = vpop.eup %2693 }
0x17fe   :  { %1814 = vrot.lane.b32.xlu0 %v2694_v45, %s2698_s2 }
0x1800   :  { %v1858_v60 = vpop.permute.xlu1 %1857 }
0x1802   :  { %1847 = vrot.lane.b32.xlu0 %v1819_v47, %s2699_s21 }
0x1806   :  { %1851 = vrot.lane.b32.xlu0 %v1821_v48, %s2699_s21 }
0x180a   :  { %1855 = vrot.lane.b32.xlu0 %v1823_v50, %s2699_s21 }
0x1870   :  { %v1815_v51 = vpop.permute.xlu0 %1814 }
0x1871   :  { %v1817_v59 = vmul.f32 %v1815_v51, %v1800_v49 }
0x1873   :  { %v1825_v10 = vmax.f32 %v1817_v59, 0.0  ;;  %1992 = vrot.lane.b32.xlu1 %v1817_v59, %s2699_s21 }
0x1874   :  { %v1848_v31 = vpop.permute.xlu0 %1847 }
0x1875   :  { %1859 = vrot.lane.b32.xlu0 %v1825_v10, %s2699_s21  ;;  %2462 = vmatmul.mubr.msk.f32.vlgmr.msra.gmra.mrb[22].mxu0 %vm259_vm3, %v1848_v31 }
0x1876   :  { %2464 = vmatprep.mubr.msk.f32.mxu0 %vm259_vm3, %v1850_v57 }
0x1877   :  { %2003 = vrot.lane.b32.xlu1 %v1811_v43, %s2700_s5 }
0x1878   :  { %v1852_v32 = vpop.permute.xlu0 %1851 }
0x1879   :  { %1998 = vrot.lane.b32.xlu0 %v3163_v13, %s2700_s5  ;;  %2465 = vmatmul.mubr.msk.f32.gmra.mrb[24].mxu0 %vm259_vm3, %v1852_v32 }
0x187a   :  { %2467 = vmatprep.mubr.msk.f32.mxu0 %vm259_vm3, %v1854_v11 }
0x187c   :  { %v1856_v56 = vpop.permute.xlu0 %1855 }
0x187d   :  { %2468 = vmatmul.mubr.msk.f32.gmra.mrb[26].mxu0 %vm259_vm3, %v1856_v56 }
0x187e   :  { %2470 = vmatprep.mubr.msk.f32.mxu0 %vm259_vm3, %v1858_v60 }
0x18e5   :  { %v1993_v61 = vpop.permute.xlu1 %1992 }
0x18e6   :  { %2064 = vst.msk [vmem:[%s3276_s11 + $0x8] sm:$0xff] %vm259_vm3, %v1993_v61 }
0x18e7   :  { %v1860_v36 = vpop.permute.xlu0 %1859 }
0x18e8   :  { %2471 = vmatmul.mubr.msk.f32.gmra.mrb[28].mxu0 %vm259_vm3, %v1860_v36 }
0x18e9   :  { %v2004_v62 = vpop.permute.xlu1 %2003 }
0x18ea   :  { %2065 = vst.msk [vmem:[%s3277_s12 + $0x8] sm:$0xff] %vm259_vm3, %v2004_v62 }
0x18eb   :  { %v1999_v63 = vpop.permute.xlu0 %1998 }
0x18ec   :  { %2001 = vst.msk [vmem:[%s3277_s12] sm:$0xff] %vm259_vm3, %v1999_v63 }
0x1948   :  { %v2463_v1 = vpop.f32.mrb[22].mxu0 }
0x1949   :  { %v1949_v41 = vadd.f32 %v2463_v1, %v2055_v0  ;;  %v1943_v3 = vpop.f32.mrb[23].mxu0 }
0x194a   :  { %v1944_v46 = vadd.f32 %v2055_v0, %v1943_v3 }
0x194b   :  { %1983 = vst.msk [vmem:[%s3275_s10 + $0x8] sm:$0xff] %vm125_vm1, %v1949_v41 }
0x194c   :  { %1982 = vst.msk [vmem:[%s3275_s10] sm:$0xff] %vm125_vm1, %v1944_v46  ;;  %v2466_v12 = vpop.f32.mrb[24].mxu0 }
0x194d   :  { %v1959_v53 = vadd.f32 %v2466_v12, %v2055_v0  ;;  %v1953_v2 = vpop.f32.mrb[25].mxu0 }
0x194e   :  { %v1954_v5 = vadd.f32 %v2055_v0, %v1953_v2 }
0x194f   :  { %1985 = vst.msk [vmem:[%s3275_s10 + $0x18] sm:$0xff] %vm125_vm1, %v1959_v53 }
0x1950   :  { %1984 = vst.msk [vmem:[%s3275_s10 + $0x10] sm:$0xff] %vm125_vm1, %v1954_v5  ;;  %v2469_v6 = vpop.f32.mrb[26].mxu0 }
0x1951   :  { %v1969_v7 = vadd.f32 %v2469_v6, %v2055_v0  ;;  %v1963_v8 = vpop.f32.mrb[27].mxu0 }
0x1952   :  { %v1964_v13 = vadd.f32 %v2055_v0, %v1963_v8 }
0x1953   :  { %1987 = vst.msk [vmem:[%s3275_s10 + $0x28] sm:$0xff] %vm125_vm1, %v1969_v7 }
0x1954   :  { %1986 = vst.msk [vmem:[%s3275_s10 + $0x20] sm:$0xff] %vm125_vm1, %v1964_v13 }
0x19bb   :  { %v2472_v52 = vpop.f32.mrb[28].mxu0 }
0x19bc   :  { %v1979_v15 = vadd.f32 %v2472_v52, %v2055_v0  ;;  %v1973_v16 = vpop.f32.mrb[29].mxu0 }
0x19bd   :  { %v1974_v17 = vadd.f32 %v2055_v0, %v1973_v16 }
0x19be   :  { %1989 = vst.msk [vmem:[%s3275_s10 + $0x38] sm:$0xff] %vm125_vm1, %v1979_v15 }
0x19bf   :  { %1988 = vst.msk [vmem:[%s3275_s10 + $0x30] sm:$0xff] %vm125_vm1, %v1974_v17 }

</bundles_post_ra>
